<compile_context>
chip_gen: v5e
topology: v5e:2x2
jax: 0.10.0
libtpu: 0.0.40
codegen_flags: <defaults>
</compile_context>

<pallas_src>
import functools

import jax
import jax.numpy as jnp
from jax.experimental import pallas as pl
from jax.experimental.pallas import tpu as pltpu


_LANE = 128


def _round_up(x, m):
    return (x + m - 1) // m * m


# ---------------------------------------------------------------------------
# Pallas kernel: folded edge features -> concat-free dense stack -> aggregation
# ---------------------------------------------------------------------------
def _make_graph_conv_kernel(aggr: str, slice_counts):
    """slice_counts[l] = #weight slices of conv layer l.

    Per layer the slices are ordered [newest hidden piece, ..., h1, x-slice].
    Layer 0 has 2 slices (folded kf-slice, folded x-slice); the last entry is
    layer_out.
    """
    n_conv = len(slice_counts)          # num_fc_layers + 1 (incl. layer_out)

    def kernel(x_ref, kf_ref, *rest):
        o_ref = rest[-1]
        params = rest[:-1]

        # unpack (weight slices..., bias) refs per layer
        layer_ws, layer_bs = [], []
        idx = 0
        for cnt in slice_counts:
            layer_ws.append(params[idx:idx + cnt])
            layer_bs.append(params[idx + cnt])
            idx += cnt + 1

        x16 = x_ref[0]                               # (tn, C)     bf16
        kf = kf_ref[0]                               # (tn, K, C)  bf16
        tn, K, C = kf.shape
        kf2 = kf.reshape(tn * K, C)

        def pdot(a, w_ref):
            return jnp.dot(a, w_ref[...], preferred_element_type=jnp.float32)

        # --- layer_first: edge feature [x, kf, kf - x] folded into weights:
        #     edge @ W0 == kf @ (W_kf + W_diff) + x @ (W_x - W_diff)
        w_kf, w_x0 = layer_ws[0]
        b0 = layer_bs[0][...]
        t_kf = pdot(kf2, w_kf).reshape(tn, K, -1)    # (tn, K, g)
        t_x = pdot(x16, w_x0)[:, None, :]            # (tn, 1, g) broadcast over K
        h = jnp.maximum(t_kf + t_x + b0, 0.0)
        pieces = [h.astype(x16.dtype)]               # newest piece first (bf16)

        # --- densenet hidden layers, concat-free: accumulate per-piece partial
        #     matmuls in f32; x contribution computed once per row.
        for li in range(1, n_conv - 1):
            ws = layer_ws[li]
            b = layer_bs[li][...]
            acc = pdot(x16, ws[-1])[:, None, :]      # (tn, 1, g)
            for p, w_ref in zip(pieces, ws[:-1]):
                acc = acc + pdot(p.reshape(tn * K, p.shape[-1]),
                                 w_ref).reshape(tn, K, -1)
            h = jnp.maximum(acc + b, 0.0)
            pieces.insert(0, h.astype(x16.dtype))

        # --- layer_out (affine, no BN / ReLU) + aggregation over K
        ws = layer_ws[-1]
        b = layer_bs[-1][...]
        if aggr == "max":
            acc = pdot(x16, ws[-1])[:, None, :]      # (tn, 1, Dp)
            for p, w_ref in zip(pieces, ws[:-1]):
                acc = acc + pdot(p.reshape(tn * K, p.shape[-1]),
                                 w_ref).reshape(tn, K, -1)
            red = jnp.max(acc + b, axis=1)           # (tn, Dp)
        else:
            # mean/sum commute with the affine layer_out -> reduce the narrow
            # hidden pieces over K first, then one small (tn, .) matmul.
            scale = (1.0 / K) if aggr == "mean" else 1.0
            x_mult = 1.0 if aggr == "mean" else float(K)
            b_mult = 1.0 if aggr == "mean" else float(K)
            acc = x_mult * pdot(x16, ws[-1])         # (tn, Dp)
            for p, w_ref in zip(pieces, ws[:-1]):
                pr = (p.astype(jnp.float32).sum(axis=1) * scale).astype(x16.dtype)
                acc = acc + pdot(pr, w_ref)
            red = acc + b * b_mult

        o_ref[0] = red.astype(o_ref.dtype)

    return kernel


# ---------------------------------------------------------------------------
# Wrapper-side parameter preparation: fold edge construction into layer_first,
# pre-split every layer's weight rows per input piece, pad layer_out lanes.
# ---------------------------------------------------------------------------
def _split_params(weights, biases, C, d_pad, compute_dtype):
    L = len(weights) - 1                 # number of BN+ReLU conv layers
    g = weights[0].shape[1]

    def cvt(w):
        return w.astype(compute_dtype)

    layer_slices, layer_biases = [], []

    # layer_first, edge = [x, kf, kf - x]  (relative_feat_only=False)
    w0 = weights[0]
    w0_x, w0_kf, w0_diff = w0[:C], w0[C:2 * C], w0[2 * C:3 * C]
    layer_slices.append([cvt(w0_kf + w0_diff), cvt(w0_x - w0_diff)])
    layer_biases.append(biases[0].reshape(1, -1).astype(jnp.float32))

    # layers_mid ... layer_last: input pieces are [h_li, ..., h_1, x]
    for li in range(1, L):
        w = weights[li]
        sl = [cvt(w[j * g:(j + 1) * g]) for j in range(li)]
        sl.append(cvt(w[li * g:li * g + C]))
        layer_slices.append(sl)
        layer_biases.append(biases[li].reshape(1, -1).astype(jnp.float32))

    # layer_out: pieces [h_L, ..., h_1, x]; zero-pad output lanes to d_pad
    w, b = weights[L], biases[L]
    D = w.shape[1]
    if d_pad > D:
        w = jnp.pad(w, ((0, 0), (0, d_pad - D)))
        b = jnp.pad(b, (0, d_pad - D))
    sl = [cvt(w[j * g:(j + 1) * g]) for j in range(L)]
    sl.append(cvt(w[L * g:L * g + C]))
    layer_slices.append(sl)
    layer_biases.append(b.reshape(1, -1).astype(jnp.float32))
    return layer_slices, layer_biases


def _pick_row_tile(n, per_row_bytes, budget_bytes):
    cands = [n] if n <= 1024 else []
    cands += [t for t in (1024, 512, 256, 128, 64, 32, 16, 8)
              if t < n and n % t == 0]
    if not cands:
        return n
    for t in cands:
        if t * per_row_bytes <= budget_bytes:
            return t
    return cands[-1]


def _graph_conv_pallas(x_bnc, knn_feat, weights, biases, *, aggr, tile_n=None):
    B, N, C = x_bnc.shape
    K = knn_feat.shape[2]
    L = len(weights) - 1
    g = weights[0].shape[1]
    D = weights[-1].shape[1]
    d_pad = _round_up(D, _LANE)
    compute_dtype = jnp.bfloat16

    layer_slices, layer_biases = _split_params(weights, biases, C, d_pad,
                                               compute_dtype)
    slice_counts = tuple(len(s) for s in layer_slices)

    # Rough per-row VMEM footprint (double-buffered tiles + live intermediates),
    # used to size the row tile conservatively for every TPU generation
    # (fits v7x's 64 MiB VMEM; larger tiles amortise per-step overhead on v5e/v6e).
    in_b = x_bnc.dtype.itemsize
    per_row = (2 * (C + K * C) * in_b          # x + kf input tiles (double buf)
               + 2 * d_pad * 4                 # output tile (double buf)
               + K * (L * g) * 2               # bf16 hidden pieces
               + 2 * K * max(g, d_pad) * 4     # live f32 accumulators
               + K * C * 2)                    # bf16 working copy of kf
    vmem_budget = 20 * 1024 * 1024
    tn = tile_n if tile_n is not None else _pick_row_tile(N, per_row, vmem_budget)
    # keep the parallel grid even so v7x's 2 TensorCores both get work
    if (tile_n is None and (B * (N // tn)) % 2 == 1
            and tn % 16 == 0 and N % (tn // 2) == 0):
        tn //= 2
    assert N % tn == 0, (N, tn)

    kernel = _make_graph_conv_kernel(aggr, slice_counts)

    wb_args, wb_specs = [], []
    for sl, b in zip(layer_slices, layer_biases):
        for w in sl:
            wb_args.append(w)
            wb_specs.append(pl.BlockSpec(w.shape, lambda bi, ni: (0, 0)))
        wb_args.append(b)
        wb_specs.append(pl.BlockSpec(b.shape, lambda bi, ni: (0, 0)))

    # advisory cost estimate
    flops = 2 * B * N * K * C * g + 2 * B * N * C * g
    for li in range(1, L):
        flops += 2 * B * N * K * (li * g) * g + 2 * B * N * C * g
    if aggr == "max":
        flops += 2 * B * N * (K * L * g + C) * d_pad
    else:
        flops += 2 * B * N * (L * g + C) * d_pad
    w_bytes = sum(int(w.size) * w.dtype.itemsize
                  for sl in layer_slices for w in sl)
    w_bytes += sum(int(b.size) * 4 for b in layer_biases)
    bytes_accessed = (x_bnc.size * in_b + knn_feat.size * in_b
                      + B * N * d_pad * 4 + w_bytes)

    vmem_limit = int(min(max(3 * tn * per_row + w_bytes + (2 << 20),
                             32 * 1024 * 1024),
                         48 * 1024 * 1024))

    out = pl.pallas_call(
        kernel,
        out_shape=jax.ShapeDtypeStruct((B, N, d_pad), jnp.float32),
        grid_spec=pltpu.PrefetchScalarGridSpec(
            num_scalar_prefetch=0,
            grid=(B, N // tn),
            in_specs=[
                pl.BlockSpec((1, tn, C), lambda bi, ni: (bi, ni, 0)),
                pl.BlockSpec((1, tn, K, C), lambda bi, ni: (bi, ni, 0, 0)),
            ] + wb_specs,
            out_specs=pl.BlockSpec((1, tn, d_pad), lambda bi, ni: (bi, ni, 0)),
        ),
        compiler_params=pltpu.CompilerParams(
            dimension_semantics=("parallel", "parallel"),
            vmem_limit_bytes=vmem_limit,
        ),
        cost_estimate=pl.CostEstimate(
            flops=int(flops), transcendentals=0,
            bytes_accessed=int(bytes_accessed)),
    )(x_bnc, knn_feat, *wb_args)
    return out[..., :D]                    # drop lane padding


# ---------------------------------------------------------------------------
# Wrapper: kNN + gather (plain JAX) + fused Pallas kernel
# ---------------------------------------------------------------------------
def get_knn_idx(pos_bnd, k, offset=0):
    """pos_bnd: (B, N, 3) -> (B, N, k) neighbour indices (offset skips self)."""
    d = jnp.sum((pos_bnd[:, :, None, :] - pos_bnd[:, None, :, :]) ** 2, axis=-1)
    return jnp.argsort(d, axis=-1)[:, :, offset:offset + k]


@functools.partial(jax.jit, static_argnames=("knn", "aggr", "tile_n"))
def graph_conv_forward(x, pos, knn_idx, weights, biases, *, knn, aggr="max",
                       tile_n=None):
    """Pallas forward of GraphConv (knn > 1, relative_feat_only=False,
    inference-mode BatchNorm folded into the conv weights)."""
    assert aggr in ("mean", "sum", "max")
    assert knn > 1
    # TODO(synk): knn == 1 (no edge features / aggregation) and
    #             relative_feat_only=True variants are not implemented.
    B, C, N = x.shape
    if knn_idx is None:
        knn_idx = get_knn_idx(jnp.transpose(pos, (0, 2, 1)), k=knn, offset=1)

    # bf16 activations into the kernel: full-rate MXU matmuls and half the HBM
    # traffic of the K-wide neighbour tensor; all accumulation stays f32.
    x_bnc = jnp.transpose(x, (0, 2, 1)).astype(jnp.bfloat16)        # (B, N, C)
    # TODO(synk): the per-row neighbour gather stays an XLA gather in the
    # wrapper (knn_feat materialised in HBM); a data-dependent in-kernel VMEM
    # row gather has no robust Mosaic lowering for this access pattern.
    knn_feat = jax.vmap(lambda xb, ib: xb[ib])(x_bnc, knn_idx)      # (B, N, K, C)

    y_bnd = _graph_conv_pallas(x_bnc, knn_feat, weights, biases,
                               aggr=aggr, tile_n=tile_n)
    return jnp.transpose(y_bnd, (0, 2, 1)), knn_idx                 # (B, D, N)


# ---------------------------------------------------------------------------
# Parameter construction (Conv1D weights with inference-mode BN folded in)
# ---------------------------------------------------------------------------
def make_graphconv_params(key, in_channels, growth_rate, num_fc_layers, eps=1e-5):
    assert num_fc_layers > 2
    C, g, L = in_channels, growth_rate, num_fc_layers
    d_out = C + L * g
    in_dims = [3 * C] + [C + i * g for i in range(1, L - 1)] + [C + (L - 1) * g, d_out]
    out_dims = [g] * L + [d_out]
    with_bn = [True] * L + [False]            # layer_out has with_bn=False

    weights, biases = [], []
    for bn, ci, co in zip(with_bn, in_dims, out_dims):
        key, kw, kb, kg, kbe, km, kv = jax.random.split(key, 7)
        w = 0.1 * jax.random.normal(kw, (ci, co), dtype=jnp.float32)
        b = 0.1 * jax.random.normal(kb, (co,), dtype=jnp.float32)
        if bn:
            gamma = 1.0 + 0.1 * jax.random.normal(kg, (co,), dtype=jnp.float32)
            beta = 0.1 * jax.random.normal(kbe, (co,), dtype=jnp.float32)
            mean = 0.1 * jax.random.normal(km, (co,), dtype=jnp.float32)
            var = 1.0 + 0.1 * jnp.abs(jax.random.normal(kv, (co,), dtype=jnp.float32))
            scale = gamma / jnp.sqrt(var + eps)
            w = w * scale[None, :]
            b = (b - mean) * scale + beta
        weights.append(w)
        biases.append(b)
    return tuple(weights), tuple(biases)


# ---------------------------------------------------------------------------
# Pure-JAX reference (same folded weights, full f32) for validation
# ---------------------------------------------------------------------------
def reference_forward(x, knn_idx, weights, biases, *, aggr):
    B, C, N = x.shape
    K = knn_idx.shape[-1]
    x_bnc = jnp.transpose(x, (0, 2, 1))
    kf = jax.vmap(lambda xb, ib: xb[ib])(x_bnc, knn_idx)            # (B, N, K, C)
    xb = jnp.broadcast_to(x_bnc[:, :, None, :], kf.shape)
    edge = jnp.concatenate([xb, kf, kf - xb], axis=-1).reshape(B, N * K, 3 * C)
    x_rep = xb.reshape(B, N * K, C)

    hi = jax.lax.Precision.HIGHEST

    def fc(h, li, relu):
        y = jnp.einsum("bri,io->bro", h, weights[li], precision=hi) + biases[li]
        return jnp.maximum(y, 0.0) if relu else y

    n_layers = len(weights)
    y = jnp.concatenate([fc(edge, 0, True), x_rep], axis=-1)
    for li in range(1, n_layers - 1):
        y = jnp.concatenate([fc(y, li, True), y], axis=-1)
    y = fc(y, n_layers - 1, False)
    D = y.shape[-1]
    y = y.reshape(B, N, K, D)
    if aggr == "max":
        red = jnp.max(y, axis=2)
    elif aggr == "mean":
        red = jnp.mean(y, axis=2)
    else:
        red = jnp.sum(y, axis=2)
    return jnp.transpose(red, (0, 2, 1))


# ---------------------------------------------------------------------------
if __name__ == "__main__":
    key = jax.random.PRNGKey(0)
    B, C, N = 2, 16, 32          # batch, in_channels, points
    K = 8                        # knn
    growth = 12                  # growth_rate
    num_fc = 3                   # num_fc_layers (must be > 2)
    D_out = C + num_fc * growth  # GraphConv.out_channels

    k_x, k_pos, k_w = jax.random.split(key, 3)
    x = jax.random.normal(k_x, (B, C, N), dtype=jnp.float32)
    pos = jax.random.normal(k_pos, (B, 3, N), dtype=jnp.float32)
    weights, biases = make_graphconv_params(k_w, C, growth, num_fc)

    knn_idx = get_knn_idx(jnp.transpose(pos, (0, 2, 1)), k=K, offset=1)

    ok = True
    for aggr in ("max", "mean", "sum"):
        y, _ = graph_conv_forward(x, pos, knn_idx, weights, biases,
                                  knn=K, aggr=aggr)
        y = jax.block_until_ready(y)
        y_ref = reference_forward(x, knn_idx, weights, biases, aggr=aggr)
        assert y.shape == (B, D_out, N), y.shape
        # kernel uses bf16 matmul inputs (f32 accumulation); reference is f32
        if not jnp.allclose(y, y_ref, atol=4e-2, rtol=4e-2):
            ok = False
            err = float(jnp.max(jnp.abs(y - y_ref)))
            print(f"MISMATCH aggr={aggr}: max abs err {err:.3e}")

    if ok:
        print("KERNEL_OK")
</pallas_src>

<mosaic_0001>
module attributes {stable_mosaic.version = 11 : i64} {
  func.func @kernel(%arg0: i32, %arg1: i32, %arg2: memref<1x32x16xbf16, #tpu.memory_space<vmem>>, %arg3: memref<1x32x8x16xbf16, #tpu.memory_space<vmem>>, %arg4: memref<16x12xbf16, #tpu.memory_space<vmem>>, %arg5: memref<16x12xbf16, #tpu.memory_space<vmem>>, %arg6: memref<1x12xf32, #tpu.memory_space<vmem>>, %arg7: memref<12x12xbf16, #tpu.memory_space<vmem>>, %arg8: memref<16x12xbf16, #tpu.memory_space<vmem>>, %arg9: memref<1x12xf32, #tpu.memory_space<vmem>>, %arg10: memref<12x12xbf16, #tpu.memory_space<vmem>>, %arg11: memref<12x12xbf16, #tpu.memory_space<vmem>>, %arg12: memref<16x12xbf16, #tpu.memory_space<vmem>>, %arg13: memref<1x12xf32, #tpu.memory_space<vmem>>, %arg14: memref<12x128xbf16, #tpu.memory_space<vmem>>, %arg15: memref<12x128xbf16, #tpu.memory_space<vmem>>, %arg16: memref<12x128xbf16, #tpu.memory_space<vmem>>, %arg17: memref<16x128xbf16, #tpu.memory_space<vmem>>, %arg18: memref<1x128xf32, #tpu.memory_space<vmem>>, %arg19: memref<1x32x128xf32, #tpu.memory_space<vmem>>) attributes {dimension_semantics = [#tpu.dimension_semantics<parallel>, #tpu.dimension_semantics<parallel>], iteration_bounds = array<i64: 2, 1>, scalar_prefetch = 0 : i64, scratch_operands = 0 : i64, tpu.core_type = #tpu.core_type<tc>, window_params = [{transform_indices = @transform_0, window_bounds = array<i64: 1, 32, 16>}, {transform_indices = @transform_1, window_bounds = array<i64: 1, 32, 8, 16>}, {pipeline_mode = #tpu.pipeline_mode<synchronous>, transform_indices = @transform_2, window_bounds = array<i64: 16, 12>}, {pipeline_mode = #tpu.pipeline_mode<synchronous>, transform_indices = @transform_3, window_bounds = array<i64: 16, 12>}, {pipeline_mode = #tpu.pipeline_mode<synchronous>, transform_indices = @transform_4, window_bounds = array<i64: 1, 12>}, {pipeline_mode = #tpu.pipeline_mode<synchronous>, transform_indices = @transform_5, window_bounds = array<i64: 12, 12>}, {pipeline_mode = #tpu.pipeline_mode<synchronous>, transform_indices = @transform_6, window_bounds = array<i64: 16, 12>}, {pipeline_mode = #tpu.pipeline_mode<synchronous>, transform_indices = @transform_7, window_bounds = array<i64: 1, 12>}, {pipeline_mode = #tpu.pipeline_mode<synchronous>, transform_indices = @transform_8, window_bounds = array<i64: 12, 12>}, {pipeline_mode = #tpu.pipeline_mode<synchronous>, transform_indices = @transform_9, window_bounds = array<i64: 12, 12>}, {pipeline_mode = #tpu.pipeline_mode<synchronous>, transform_indices = @transform_10, window_bounds = array<i64: 16, 12>}, {pipeline_mode = #tpu.pipeline_mode<synchronous>, transform_indices = @transform_11, window_bounds = array<i64: 1, 12>}, {pipeline_mode = #tpu.pipeline_mode<synchronous>, transform_indices = @transform_12, window_bounds = array<i64: 12, 128>}, {pipeline_mode = #tpu.pipeline_mode<synchronous>, transform_indices = @transform_13, window_bounds = array<i64: 12, 128>}, {pipeline_mode = #tpu.pipeline_mode<synchronous>, transform_indices = @transform_14, window_bounds = array<i64: 12, 128>}, {pipeline_mode = #tpu.pipeline_mode<synchronous>, transform_indices = @transform_15, window_bounds = array<i64: 16, 128>}, {pipeline_mode = #tpu.pipeline_mode<synchronous>, transform_indices = @transform_16, window_bounds = array<i64: 1, 128>}, {transform_indices = @transform_17, window_bounds = array<i64: 1, 32, 128>}]} {
    %c0 = arith.constant 0 : index
    %c0_0 = arith.constant 0 : index
    %c0_1 = arith.constant 0 : index
    %0 = vector.load %arg2[%c0, %c0_0, %c0_1] : memref<1x32x16xbf16, #tpu.memory_space<vmem>>, vector<1x32x16xbf16>
    %1 = vector.shape_cast %0 : vector<1x32x16xbf16> to vector<32x16xbf16>
    %c0_2 = arith.constant 0 : index
    %c0_3 = arith.constant 0 : index
    %c0_4 = arith.constant 0 : index
    %c0_5 = arith.constant 0 : index
    %2 = vector.load %arg3[%c0_2, %c0_3, %c0_4, %c0_5] : memref<1x32x8x16xbf16, #tpu.memory_space<vmem>>, vector<1x32x8x16xbf16>
    %3 = vector.shape_cast %2 : vector<1x32x8x16xbf16> to vector<32x8x16xbf16>
    %4 = vector.shape_cast %3 : vector<32x8x16xbf16> to vector<256x16xbf16>
    %c0_6 = arith.constant 0 : index
    %c0_7 = arith.constant 0 : index
    %5 = vector.load %arg6[%c0_6, %c0_7] : memref<1x12xf32, #tpu.memory_space<vmem>>, vector<1x12xf32>
    %c0_8 = arith.constant 0 : index
    %c0_9 = arith.constant 0 : index
    %6 = vector.load %arg4[%c0_8, %c0_9] : memref<16x12xbf16, #tpu.memory_space<vmem>>, vector<16x12xbf16>
    %cst = arith.constant dense<0.000000e+00> : vector<256x12xf32>
    %7 = tpu.matmul %4, %6, %cst {dimension_numbers = #tpu.dot_dimension_numbers<[1], [0], [0], [1], [0, 0, 1, 1], [], []>} : vector<256x16xbf16>, vector<16x12xbf16>, vector<256x12xf32> -> vector<256x12xf32>
    %8 = vector.shape_cast %7 : vector<256x12xf32> to vector<32x8x12xf32>
    %c0_10 = arith.constant 0 : index
    %c0_11 = arith.constant 0 : index
    %9 = vector.load %arg5[%c0_10, %c0_11] : memref<16x12xbf16, #tpu.memory_space<vmem>>, vector<16x12xbf16>
    %cst_12 = arith.constant dense<0.000000e+00> : vector<32x12xf32>
    %10 = tpu.matmul %1, %9, %cst_12 {dimension_numbers = #tpu.dot_dimension_numbers<[1], [0], [0], [1], [0, 0, 1, 1], [], []>} : vector<32x16xbf16>, vector<16x12xbf16>, vector<32x12xf32> -> vector<32x12xf32>
    %11 = vector.shape_cast %10 : vector<32x12xf32> to vector<32x1x12xf32>
    %12 = vector.broadcast %11 : vector<32x1x12xf32> to vector<32x8x12xf32>
    %13 = arith.addf %8, %12 : vector<32x8x12xf32>
    %14 = vector.shape_cast %5 : vector<1x12xf32> to vector<1x1x12xf32>
    %15 = vector.broadcast %14 : vector<1x1x12xf32> to vector<32x8x12xf32>
    %16 = arith.addf %13, %15 : vector<32x8x12xf32>
    %cst_13 = arith.constant 0.000000e+00 : f32
    %17 = vector.broadcast %cst_13 : f32 to vector<32x8x12xf32>
    %18 = arith.maximumf %16, %17 : vector<32x8x12xf32>
    %19 = arith.truncf %18 : vector<32x8x12xf32> to vector<32x8x12xbf16>
    %c0_14 = arith.constant 0 : index
    %c0_15 = arith.constant 0 : index
    %20 = vector.load %arg9[%c0_14, %c0_15] : memref<1x12xf32, #tpu.memory_space<vmem>>, vector<1x12xf32>
    %c0_16 = arith.constant 0 : index
    %c0_17 = arith.constant 0 : index
    %21 = vector.load %arg8[%c0_16, %c0_17] : memref<16x12xbf16, #tpu.memory_space<vmem>>, vector<16x12xbf16>
    %cst_18 = arith.constant dense<0.000000e+00> : vector<32x12xf32>
    %22 = tpu.matmul %1, %21, %cst_18 {dimension_numbers = #tpu.dot_dimension_numbers<[1], [0], [0], [1], [0, 0, 1, 1], [], []>} : vector<32x16xbf16>, vector<16x12xbf16>, vector<32x12xf32> -> vector<32x12xf32>
    %23 = vector.shape_cast %22 : vector<32x12xf32> to vector<32x1x12xf32>
    %24 = vector.shape_cast %19 : vector<32x8x12xbf16> to vector<256x12xbf16>
    %c0_19 = arith.constant 0 : index
    %c0_20 = arith.constant 0 : index
    %25 = vector.load %arg7[%c0_19, %c0_20] : memref<12x12xbf16, #tpu.memory_space<vmem>>, vector<12x12xbf16>
    %cst_21 = arith.constant dense<0.000000e+00> : vector<256x12xf32>
    %26 = tpu.matmul %24, %25, %cst_21 {dimension_numbers = #tpu.dot_dimension_numbers<[1], [0], [0], [1], [0, 0, 1, 1], [], []>} : vector<256x12xbf16>, vector<12x12xbf16>, vector<256x12xf32> -> vector<256x12xf32>
    %27 = vector.shape_cast %26 : vector<256x12xf32> to vector<32x8x12xf32>
    %28 = vector.broadcast %23 : vector<32x1x12xf32> to vector<32x8x12xf32>
    %29 = arith.addf %28, %27 : vector<32x8x12xf32>
    %30 = vector.shape_cast %20 : vector<1x12xf32> to vector<1x1x12xf32>
    %31 = vector.broadcast %30 : vector<1x1x12xf32> to vector<32x8x12xf32>
    %32 = arith.addf %29, %31 : vector<32x8x12xf32>
    %cst_22 = arith.constant 0.000000e+00 : f32
    %33 = vector.broadcast %cst_22 : f32 to vector<32x8x12xf32>
    %34 = arith.maximumf %32, %33 : vector<32x8x12xf32>
    %35 = arith.truncf %34 : vector<32x8x12xf32> to vector<32x8x12xbf16>
    %c0_23 = arith.constant 0 : index
    %c0_24 = arith.constant 0 : index
    %36 = vector.load %arg13[%c0_23, %c0_24] : memref<1x12xf32, #tpu.memory_space<vmem>>, vector<1x12xf32>
    %c0_25 = arith.constant 0 : index
    %c0_26 = arith.constant 0 : index
    %37 = vector.load %arg12[%c0_25, %c0_26] : memref<16x12xbf16, #tpu.memory_space<vmem>>, vector<16x12xbf16>
    %cst_27 = arith.constant dense<0.000000e+00> : vector<32x12xf32>
    %38 = tpu.matmul %1, %37, %cst_27 {dimension_numbers = #tpu.dot_dimension_numbers<[1], [0], [0], [1], [0, 0, 1, 1], [], []>} : vector<32x16xbf16>, vector<16x12xbf16>, vector<32x12xf32> -> vector<32x12xf32>
    %39 = vector.shape_cast %38 : vector<32x12xf32> to vector<32x1x12xf32>
    %40 = vector.shape_cast %35 : vector<32x8x12xbf16> to vector<256x12xbf16>
    %c0_28 = arith.constant 0 : index
    %c0_29 = arith.constant 0 : index
    %41 = vector.load %arg10[%c0_28, %c0_29] : memref<12x12xbf16, #tpu.memory_space<vmem>>, vector<12x12xbf16>
    %cst_30 = arith.constant dense<0.000000e+00> : vector<256x12xf32>
    %42 = tpu.matmul %40, %41, %cst_30 {dimension_numbers = #tpu.dot_dimension_numbers<[1], [0], [0], [1], [0, 0, 1, 1], [], []>} : vector<256x12xbf16>, vector<12x12xbf16>, vector<256x12xf32> -> vector<256x12xf32>
    %43 = vector.shape_cast %42 : vector<256x12xf32> to vector<32x8x12xf32>
    %44 = vector.broadcast %39 : vector<32x1x12xf32> to vector<32x8x12xf32>
    %45 = arith.addf %44, %43 : vector<32x8x12xf32>
    %46 = vector.shape_cast %19 : vector<32x8x12xbf16> to vector<256x12xbf16>
    %c0_31 = arith.constant 0 : index
    %c0_32 = arith.constant 0 : index
    %47 = vector.load %arg11[%c0_31, %c0_32] : memref<12x12xbf16, #tpu.memory_space<vmem>>, vector<12x12xbf16>
    %cst_33 = arith.constant dense<0.000000e+00> : vector<256x12xf32>
    %48 = tpu.matmul %46, %47, %cst_33 {dimension_numbers = #tpu.dot_dimension_numbers<[1], [0], [0], [1], [0, 0, 1, 1], [], []>} : vector<256x12xbf16>, vector<12x12xbf16>, vector<256x12xf32> -> vector<256x12xf32>
    %49 = vector.shape_cast %48 : vector<256x12xf32> to vector<32x8x12xf32>
    %50 = arith.addf %45, %49 : vector<32x8x12xf32>
    %51 = vector.shape_cast %36 : vector<1x12xf32> to vector<1x1x12xf32>
    %52 = vector.broadcast %51 : vector<1x1x12xf32> to vector<32x8x12xf32>
    %53 = arith.addf %50, %52 : vector<32x8x12xf32>
    %cst_34 = arith.constant 0.000000e+00 : f32
    %54 = vector.broadcast %cst_34 : f32 to vector<32x8x12xf32>
    %55 = arith.maximumf %53, %54 : vector<32x8x12xf32>
    %56 = arith.truncf %55 : vector<32x8x12xf32> to vector<32x8x12xbf16>
    %c0_35 = arith.constant 0 : index
    %c0_36 = arith.constant 0 : index
    %57 = vector.load %arg18[%c0_35, %c0_36] : memref<1x128xf32, #tpu.memory_space<vmem>>, vector<1x128xf32>
    %c0_37 = arith.constant 0 : index
    %c0_38 = arith.constant 0 : index
    %58 = vector.load %arg17[%c0_37, %c0_38] : memref<16x128xbf16, #tpu.memory_space<vmem>>, vector<16x128xbf16>
    %cst_39 = arith.constant dense<0.000000e+00> : vector<32x128xf32>
    %59 = tpu.matmul %1, %58, %cst_39 {dimension_numbers = #tpu.dot_dimension_numbers<[1], [0], [0], [1], [0, 0, 1, 1], [], []>} : vector<32x16xbf16>, vector<16x128xbf16>, vector<32x128xf32> -> vector<32x128xf32>
    %60 = vector.shape_cast %59 : vector<32x128xf32> to vector<32x1x128xf32>
    %61 = vector.shape_cast %56 : vector<32x8x12xbf16> to vector<256x12xbf16>
    %c0_40 = arith.constant 0 : index
    %c0_41 = arith.constant 0 : index
    %62 = vector.load %arg14[%c0_40, %c0_41] : memref<12x128xbf16, #tpu.memory_space<vmem>>, vector<12x128xbf16>
    %cst_42 = arith.constant dense<0.000000e+00> : vector<256x128xf32>
    %63 = tpu.matmul %61, %62, %cst_42 {dimension_numbers = #tpu.dot_dimension_numbers<[1], [0], [0], [1], [0, 0, 1, 1], [], []>} : vector<256x12xbf16>, vector<12x128xbf16>, vector<256x128xf32> -> vector<256x128xf32>
    %64 = vector.shape_cast %63 : vector<256x128xf32> to vector<32x8x128xf32>
    %65 = vector.broadcast %60 : vector<32x1x128xf32> to vector<32x8x128xf32>
    %66 = arith.addf %65, %64 : vector<32x8x128xf32>
    %67 = vector.shape_cast %35 : vector<32x8x12xbf16> to vector<256x12xbf16>
    %c0_43 = arith.constant 0 : index
    %c0_44 = arith.constant 0 : index
    %68 = vector.load %arg15[%c0_43, %c0_44] : memref<12x128xbf16, #tpu.memory_space<vmem>>, vector<12x128xbf16>
    %cst_45 = arith.constant dense<0.000000e+00> : vector<256x128xf32>
    %69 = tpu.matmul %67, %68, %cst_45 {dimension_numbers = #tpu.dot_dimension_numbers<[1], [0], [0], [1], [0, 0, 1, 1], [], []>} : vector<256x12xbf16>, vector<12x128xbf16>, vector<256x128xf32> -> vector<256x128xf32>
    %70 = vector.shape_cast %69 : vector<256x128xf32> to vector<32x8x128xf32>
    %71 = arith.addf %66, %70 : vector<32x8x128xf32>
    %72 = vector.shape_cast %19 : vector<32x8x12xbf16> to vector<256x12xbf16>
    %c0_46 = arith.constant 0 : index
    %c0_47 = arith.constant 0 : index
    %73 = vector.load %arg16[%c0_46, %c0_47] : memref<12x128xbf16, #tpu.memory_space<vmem>>, vector<12x128xbf16>
    %cst_48 = arith.constant dense<0.000000e+00> : vector<256x128xf32>
    %74 = tpu.matmul %72, %73, %cst_48 {dimension_numbers = #tpu.dot_dimension_numbers<[1], [0], [0], [1], [0, 0, 1, 1], [], []>} : vector<256x12xbf16>, vector<12x128xbf16>, vector<256x128xf32> -> vector<256x128xf32>
    %75 = vector.shape_cast %74 : vector<256x128xf32> to vector<32x8x128xf32>
    %76 = arith.addf %71, %75 : vector<32x8x128xf32>
    %77 = vector.shape_cast %57 : vector<1x128xf32> to vector<1x1x128xf32>
    %78 = vector.broadcast %77 : vector<1x1x128xf32> to vector<32x8x128xf32>
    %79 = arith.addf %76, %78 : vector<32x8x128xf32>
    %cst_49 = arith.constant dense<0xFF800000> : vector<32x128xf32>
    %80 = vector.multi_reduction <maximumf>, %79, %cst_49 [1] : vector<32x8x128xf32> to vector<32x128xf32>
    %c0_50 = arith.constant 0 : index
    %c0_51 = arith.constant 0 : index
    %c0_52 = arith.constant 0 : index
    %81 = vector.load %arg19[%c0_50, %c0_51, %c0_52] : memref<1x32x128xf32, #tpu.memory_space<vmem>>, vector<1x32x128xf32>
    %82 = vector.shape_cast %81 : vector<1x32x128xf32> to vector<32x128xf32>
    %83 = vector.shape_cast %80 : vector<32x128xf32> to vector<1x32x128xf32>
    tpu.vector_store %arg19[%c0_50, %c0_51, %c0_52], %83 {strides = array<i32>} : memref<1x32x128xf32, #tpu.memory_space<vmem>>, vector<1x32x128xf32>,
    return
  }
  func.func @transform_0(%arg0: i32, %arg1: i32) -> (i32, i32, i32) {
    %c0_i32 = arith.constant 0 : i32
    %c0_i32_0 = arith.constant 0 : i32
    return %arg0, %arg1, %c0_i32 : i32, i32, i32
  }
  func.func @transform_1(%arg0: i32, %arg1: i32) -> (i32, i32, i32, i32) {
    %c0_i32 = arith.constant 0 : i32
    %c0_i32_0 = arith.constant 0 : i32
    %c0_i32_1 = arith.constant 0 : i32
    return %arg0, %arg1, %c0_i32, %c0_i32_0 : i32, i32, i32, i32
  }
  func.func @transform_2(%arg0: i32, %arg1: i32) -> (i32, i32) {
    %c0_i32 = arith.constant 0 : i32
    %c0_i32_0 = arith.constant 0 : i32
    %c0_i32_1 = arith.constant 0 : i32
    return %c0_i32, %c0_i32_0 : i32, i32
  }
  func.func @transform_3(%arg0: i32, %arg1: i32) -> (i32, i32) {
    %c0_i32 = arith.constant 0 : i32
    %c0_i32_0 = arith.constant 0 : i32
    %c0_i32_1 = arith.constant 0 : i32
    return %c0_i32, %c0_i32_0 : i32, i32
  }
  func.func @transform_4(%arg0: i32, %arg1: i32) -> (i32, i32) {
    %c0_i32 = arith.constant 0 : i32
    %c0_i32_0 = arith.constant 0 : i32
    %c0_i32_1 = arith.constant 0 : i32
    return %c0_i32, %c0_i32_0 : i32, i32
  }
  func.func @transform_5(%arg0: i32, %arg1: i32) -> (i32, i32) {
    %c0_i32 = arith.constant 0 : i32
    %c0_i32_0 = arith.constant 0 : i32
    %c0_i32_1 = arith.constant 0 : i32
    return %c0_i32, %c0_i32_0 : i32, i32
  }
  func.func @transform_6(%arg0: i32, %arg1: i32) -> (i32, i32) {
    %c0_i32 = arith.constant 0 : i32
    %c0_i32_0 = arith.constant 0 : i32
    %c0_i32_1 = arith.constant 0 : i32
    return %c0_i32, %c0_i32_0 : i32, i32
  }
  func.func @transform_7(%arg0: i32, %arg1: i32) -> (i32, i32) {
    %c0_i32 = arith.constant 0 : i32
    %c0_i32_0 = arith.constant 0 : i32
    %c0_i32_1 = arith.constant 0 : i32
    return %c0_i32, %c0_i32_0 : i32, i32
  }
  func.func @transform_8(%arg0: i32, %arg1: i32) -> (i32, i32) {
    %c0_i32 = arith.constant 0 : i32
    %c0_i32_0 = arith.constant 0 : i32
    %c0_i32_1 = arith.constant 0 : i32
    return %c0_i32, %c0_i32_0 : i32, i32
  }
  func.func @transform_9(%arg0: i32, %arg1: i32) -> (i32, i32) {
    %c0_i32 = arith.constant 0 : i32
    %c0_i32_0 = arith.constant 0 : i32
    %c0_i32_1 = arith.constant 0 : i32
    return %c0_i32, %c0_i32_0 : i32, i32
  }
  func.func @transform_10(%arg0: i32, %arg1: i32) -> (i32, i32) {
    %c0_i32 = arith.constant 0 : i32
    %c0_i32_0 = arith.constant 0 : i32
    %c0_i32_1 = arith.constant 0 : i32
    return %c0_i32, %c0_i32_0 : i32, i32
  }
  func.func @transform_11(%arg0: i32, %arg1: i32) -> (i32, i32) {
    %c0_i32 = arith.constant 0 : i32
    %c0_i32_0 = arith.constant 0 : i32
    %c0_i32_1 = arith.constant 0 : i32
    return %c0_i32, %c0_i32_0 : i32, i32
  }
  func.func @transform_12(%arg0: i32, %arg1: i32) -> (i32, i32) {
    %c0_i32 = arith.constant 0 : i32
    %c0_i32_0 = arith.constant 0 : i32
    %c0_i32_1 = arith.constant 0 : i32
    return %c0_i32, %c0_i32_0 : i32, i32
  }
  func.func @transform_13(%arg0: i32, %arg1: i32) -> (i32, i32) {
    %c0_i32 = arith.constant 0 : i32
    %c0_i32_0 = arith.constant 0 : i32
    %c0_i32_1 = arith.constant 0 : i32
    return %c0_i32, %c0_i32_0 : i32, i32
  }
  func.func @transform_14(%arg0: i32, %arg1: i32) -> (i32, i32) {
    %c0_i32 = arith.constant 0 : i32
    %c0_i32_0 = arith.constant 0 : i32
    %c0_i32_1 = arith.constant 0 : i32
    return %c0_i32, %c0_i32_0 : i32, i32
  }
  func.func @transform_15(%arg0: i32, %arg1: i32) -> (i32, i32) {
    %c0_i32 = arith.constant 0 : i32
    %c0_i32_0 = arith.constant 0 : i32
    %c0_i32_1 = arith.constant 0 : i32
    return %c0_i32, %c0_i32_0 : i32, i32
  }
  func.func @transform_16(%arg0: i32, %arg1: i32) -> (i32, i32) {
    %c0_i32 = arith.constant 0 : i32
    %c0_i32_0 = arith.constant 0 : i32
    %c0_i32_1 = arith.constant 0 : i32
    return %c0_i32, %c0_i32_0 : i32, i32
  }
  func.func @transform_17(%arg0: i32, %arg1: i32) -> (i32, i32, i32) {
    %c0_i32 = arith.constant 0 : i32
    %c0_i32_0 = arith.constant 0 : i32
    return %arg0, %arg1, %c0_i32 : i32, i32, i32
  }
}

</mosaic_0001>

<bundles_post_ra>
// kernel: graph_conv_forward.1
= control target key start
LH: loop header
LB: loop body
LE: loop exit
PB: predicated region body
PF: predicated region fallthrough
CT: control target
= control target key end

     0   :  { %s3734_s24 = smov 0   ;;  %s3736_s25 = smov 0   ;;  %s4618_s0 = inlined_call_operand.vmem [shape: bf16[2,32,16], index: 0, kind: input, shape index: {}]   ;;  %s4619_s1 = inlined_call_operand.vmem [shape: bf16[2,32,8,16], index: 1, kind: input, shape index: {}]   ;;  %s4620_s2 = inlined_call_operand.vmem [shape: bf16[16,12], index: 2, kind: input, shape index: {}]   ;;  %s4621_s3 = inlined_call_operand.vmem [shape: bf16[16,12], index: 3, kind: input, shape index: {}]   ;;  %s4622_s4 = inlined_call_operand.vmem [shape: f32[1,12], index: 4, kind: input, shape index: {}]   ;;  %s4623_s5 = inlined_call_operand.vmem [shape: bf16[12,12], index: 5, kind: input, shape index: {}]   ;;  %s4624_s6 = inlined_call_operand.vmem [shape: bf16[16,12], index: 6, kind: input, shape index: {}]   ;;  %s4625_s7 = inlined_call_operand.vmem [shape: f32[1,12], index: 7, kind: input, shape index: {}]   ;;  %s4626_s8 = inlined_call_operand.vmem [shape: bf16[12,12], index: 8, kind: input, shape index: {}]   ;;  %s4627_s9 = inlined_call_operand.vmem [shape: bf16[12,12], index: 9, kind: input, shape index: {}]   ;;  %s4628_s10 = inlined_call_operand.vmem [shape: bf16[16,12], index: 10, kind: input, shape index: {}]   ;;  %s4629_s11 = inlined_call_operand.vmem [shape: f32[1,12], index: 11, kind: input, shape index: {}]   ;;  %s4630_s12 = inlined_call_operand.vmem [shape: bf16[12,128], index: 12, kind: input, shape index: {}]   ;;  %s4631_s13 = inlined_call_operand.vmem [shape: bf16[12,128], index: 13, kind: input, shape index: {}]   ;;  %s4632_s14 = inlined_call_operand.vmem [shape: bf16[12,128], index: 14, kind: input, shape index: {}]   ;;  %s4633_s15 = inlined_call_operand.vmem [shape: bf16[16,128], index: 15, kind: input, shape index: {}]   ;;  %s4634_s16 = inlined_call_operand.vmem [shape: f32[1,128], index: 16, kind: input, shape index: {}]   ;;  %s4635_s17 = inlined_call_operand.vmem [shape: f32[2,32,128], index: 17, kind: output, shape index: {}]  }
   0x1   :  { %4636 = sst [smem:[#allocation2_spill]] %s4618_s0  ;;  %s3738_s26 = smov 0  }
   0x2   :  { %4637 = sst [smem:[#allocation3_spill]] %s4619_s1 }
   0x3 LB: > { %s39_s27 = sadd.s32 1, %s3638_s25  ;;  %p3311_p0 = scmp.ge.s32.totalorder %s3642_s26, 1  ;;  %s3642_s26 = sphi %s3738_s26, %s27_s26   ;;  %s3638_s25 = sphi %s3736_s25, %s4641_s25   ;;  %s3634_s24 = sphi %s3734_s24, %s4640_s24  }
   0x4   : > { %p41_p1 = scmp.ge.s32.totalorder %s39_s27, 2  ;;  %p525_p2 = scmp.lt.s32.totalorder %s3642_s26, 3 }
   0x6   : > { %s4643_s27 = smov (%p41_p1, %s39_s27), 0  ;;  %p526_p3 = pnand %p3311_p0, %p525_p2 }
   0x7   : > { %p595_p4 = scmp.lt.s32.totalorder (!%p526_p3), %s3634_s24, 1  ;;  %s4638_s20 = sld [smem:[#allocation3_spill]] (!%p526_p3) }
   0x8   : > { %529 = sbr.rel (%p526_p3) target bundleno = 999 (0x3e7), region = 88  ;;  %s4639_s29 = sld [smem:[#allocation2_spill]] (!%p526_p3) }
   0xd   : > { %v3577_v0 = vld [vmem:[%s4620_s2] sm:$0xff]  ;;  %s4645_s24 = smov (!%p595_p4, %s3634_s24), 1  ;;  %vm750_vm0 = vcmask 130048   ;;  %vm1354_vm1 = vcmask 1045504   ;;  %vm1305_vm2 = vcmask 97280   ;;  %vm3159_vm3 = vcmask 1041409  }
   0xe   : > { %v3578_v1 = vld [vmem:[%s4621_s3] sm:$0xff]  ;;  %806 = vmatpush.bf16.msra.mxu0 %v3577_v0  ;;  %3588 = vmatpush.bf16.msra.mxu1 %v3577_v0  ;;  %s3557_s18 = sshll.u32 %s4645_s24, 7  ;;  %s3556_s22 = sshll.u32 %s4645_s24, 4  ;;  %vm3161_vm4 = vcmask 1042434   ;;  %vm3163_vm5 = vcmask 1043459   ;;  %vm3165_vm6 = vcmask 1044484  }
   0xf   : > { %s3764_s21 = scalar_lea.vmem %s4638_s20, %s3557_s18  ;;  %s602_s0 = scalar_lea.vmem %s4639_s29, %s3556_s22  ;;  %v3424_v29 = vld [vmem:[%s4623_s5] sm:$0xf]  ;;  %v3580_v30 = vld [vmem:[%s4623_s5] sm:$0x30]  ;;  %vm3167_vm7 = vcmask 1045509   ;;  %vm3169_vm8 = vcmask 1046534  }
  0x10   : > { %v3561_v2 = vld [vmem:[%s3764_s21] sm:$0xff]  ;;  %v3562_v4 = vld [vmem:[%s3764_s21 + $0x8] sm:$0xff]  ;;  %v3563_v6 = vld [vmem:[%s3764_s21 + $0x10] sm:$0xff]  ;;  %v3425_v32 = vor.u32 %v3580_v30, %v3424_v29  ;;  %s3558_s22 = sshll.u32 %s4645_s24, 5  ;;  %vm3171_vm9 = vcmask 1047559  }
  0x11   : > { %v3573_v3 = vld [vmem:[%s3764_s21 + $0x60] sm:$0xff]  ;;  %3386 = vmatmul.msk.bf16.vlgmr.msra.gmra.mxu0 %vm750_vm0, %v3561_v2  ;;  %v3574_v5 = vld [vmem:[%s3764_s21 + $0x68] sm:$0xff]  ;;  %v3575_v7 = vld [vmem:[%s3764_s21 + $0x70] sm:$0xff] }
  0x12   : > { %919 = vmatpush.bf16.msrb.mxu1 %v3578_v1  ;;  %v3564_v8 = vld [vmem:[%s3764_s21 + $0x18] sm:$0xff]  ;;  %v3565_v10 = vld [vmem:[%s3764_s21 + $0x20] sm:$0xff]  ;;  %v3566_v12 = vld [vmem:[%s3764_s21 + $0x28] sm:$0xff]  ;;  %v1356_v33 = vsel %vm1354_vm1, %v3425_v32, 0 }
  0x13   : > { %3398 = vmatmul.msk.bf16.vlgmr.msra.gmra.mxu1 %vm750_vm0, %v3573_v3  ;;  %v3576_v9 = vld [vmem:[%s3764_s21 + $0x78] sm:$0xff]  ;;  %v3787_v11 = vld [vmem:[%s602_s0] sm:$0xff]  ;;  %v3793_v13 = vld [vmem:[%s602_s0 + $0x8] sm:$0xff]  ;;  %3589 = vmatpush.bf16.msra.mxu3 %v1356_v33 }
  0x14   : > { %v3567_v14 = vld [vmem:[%s3764_s21 + $0x30] sm:$0xff]  ;;  %v3568_v15 = vld [vmem:[%s3764_s21 + $0x38] sm:$0xff]  ;;  %v3569_v16 = vld [vmem:[%s3764_s21 + $0x40] sm:$0xff] }
  0x15   : > { %v3570_v21 = vld [vmem:[%s3764_s21 + $0x48] sm:$0xff]  ;;  %v3571_v26 = vld [vmem:[%s3764_s21 + $0x50] sm:$0xff]  ;;  %v3579_v31 = vld [vmem:[%s4624_s6] sm:$0xff] }
  0x16   : > { %1174 = vmatpush.bf16.msra.mxu2 %v3579_v31  ;;  %1365 = vmatpush.bf16.msra.mxu1 %v1356_v33  ;;  %v3572_v36 = vld [vmem:[%s3764_s21 + $0x58] sm:$0xff]  ;;  %v3845_v44 = vld [vmem:[%s4622_s4] ss:$0 sm:$0xff]  ;;  %s4479_s21 = scalar_lea.vmem %s4635_s17, %s3558_s22 }
  0x19   : > { %3420 = vmatmul.msk.bf16.vlgmr.msra.gmra.mxu2 %vm750_vm0, %v3787_v11 }
  0x21   : > { %3387 = vmatmul.msk.bf16.gmra.mxu0 %vm750_vm0, %v3562_v4 }
  0x23   : > { %3399 = vmatmul.msk.bf16.gmra.mxu1 %vm750_vm0, %v3574_v5 }
  0x29   : > { %3421 = vmatmul.msk.bf16.gmra.mxu2 %vm750_vm0, %v3793_v13 }
  0x31   : > { %3388 = vmatmul.msk.bf16.gmra.mxu0 %vm750_vm0, %v3563_v6 }
  0x33   : > { %3400 = vmatmul.msk.bf16.gmra.mxu1 %vm750_vm0, %v3575_v7 }
  0x41   : > { %3389 = vmatmul.msk.bf16.gmra.mxu0 %vm750_vm0, %v3564_v8 }
  0x43   : > { %3401 = vmatmul.msk.bf16.gmra.mxu1 %vm750_vm0, %v3576_v9 }
  0x51   : > { %3390 = vmatmul.msk.bf16.gmra.mxu0 %vm750_vm0, %v3565_v10 }
  0x53   : > { %3414 = vmatmul.msk.bf16.vlgmr.msrb.gmra.mxu1 %vm750_vm0, %v3787_v11 }
  0x61   : > { %3391 = vmatmul.msk.bf16.gmra.mxu0 %vm750_vm0, %v3566_v12 }
  0x63   : > { %3415 = vmatmul.msk.bf16.gmra.mxu1 %vm750_vm0, %v3793_v13 }
  0x71   : > { %3392 = vmatmul.msk.bf16.gmra.mxu0 %vm750_vm0, %v3567_v14 }
  0x81   : > { %3393 = vmatmul.msk.bf16.gmra.mxu0 %vm750_vm0, %v3568_v15 }
  0x8e   : > { %v808_v17 = vpop.f32.mrf.mxu0 }
  0x90   : > { %v3803_v18 = vpop.f32.mrf.mxu1 }
  0x91   : > { %3394 = vmatmul.msk.bf16.gmra.mxu0 %vm750_vm0, %v3569_v16 }
  0x96   : > { %v810_v19 = vpop.f32.mrf.mxu0 }
  0x98   : > { %v3806_v20 = vpop.f32.mrf.mxu1 }
  0x9e   : > { %v813_v22 = vpop.f32.mrf.mxu0 }
  0xa0   : > { %v3809_v23 = vpop.f32.mrf.mxu1 }
  0xa1   : > { %3395 = vmatmul.msk.bf16.gmra.mxu0 %vm750_vm0, %v3570_v21 }
  0xa6   : > { %v815_v24 = vpop.f32.mrf.mxu0 }
  0xa8   : > { %v3812_v25 = vpop.f32.mrf.mxu1 }
  0xae   : > { %v818_v27 = vpop.f32.mrf.mxu0 }
  0xb0   : > { %v3815_v28 = vpop.f32.mrf.mxu1 }
  0xb1   : > { %3396 = vmatmul.msk.bf16.gmra.mxu0 %vm750_vm0, %v3571_v26 }
  0xb6   : > { %v820_v34 = vpop.f32.mrf.mxu0 }
  0xb8   : > { %v3830_v35 = vpop.f32.mrf.mxu1 }
  0xbe   : > { %v823_v37 = vpop.f32.mrf.mxu0 }
  0xc0   : > { %v3833_v38 = vpop.f32.mrf.mxu1 }
  0xc1   : > { %3397 = vmatmul.msk.bf16.gmra.mxu0 %vm750_vm0, %v3572_v36 }
  0xc6   : > { %v825_v39 = vpop.f32.mrf.mxu0 }
  0xc8   : > { %v3838_v40 = vpop.f32.mrf.mxu1 }
  0xce   : > { %v3840_v41 = vpop.f32.mrf.mxu0 }
  0xd0   : > { %v921_v42 = vpop.f32.mrf.mxu1 }
  0xd1   : > { %v935_v43 = vrot.slane %v921_v42, 1  ;;  %v963_v45 = vperm.slane %v921_v42, 0  ;;  %v938_v46 = vrot.slane %v921_v42, 4  ;;  %v939_v47 = vrot.slane %v921_v42, 5 }
  0xd2   : > { %v936_v48 = vrot.slane %v921_v42, 2  ;;  %v937_v49 = vrot.slane %v921_v42, 3  ;;  %v940_v54 = vrot.slane %v921_v42, 6  ;;  %v941_v55 = vrot.slane %v921_v42, 7 }
  0xd3   : > { %v964_v50 = vperm.slane %v935_v43, 0  ;;  %v1027_v51 = vadd.f32 %v963_v45, %v808_v17  ;;  %v967_v52 = vperm.slane %v938_v46, 0  ;;  %v968_v53 = vperm.slane %v939_v47, 0 }
  0xd4   : > { %v965_v60 = vperm.slane %v936_v48, 0  ;;  %v966_v61 = vperm.slane %v937_v49, 0  ;;  %v969_v3 = vperm.slane %v940_v54, 0  ;;  %v970_v4 = vperm.slane %v941_v55, 0 }
  0xd5   : > { %v1028_v56 = vadd.f32 %v964_v50, %v810_v19  ;;  %v1062_v57 = vadd.f32 %v3845_v44, %v1027_v51  ;;  %v1031_v58 = vadd.f32 %v967_v52, %v818_v27  ;;  %v1032_v59 = vadd.f32 %v968_v53, %v820_v34 }
  0xd6   : > { %v830_v2 = vpop.f32.mrf.mxu0  ;;  %v1029_v12 = vadd.f32 %v965_v60, %v813_v22  ;;  %v1030_v14 = vadd.f32 %v966_v61, %v815_v24  ;;  %v1033_v16 = vadd.f32 %v969_v3, %v823_v37  ;;  %v1034_v17 = vadd.f32 %v970_v4, %v825_v39 }
  0xd7   : > { %v1063_v62 = vadd.f32 %v3845_v44, %v1028_v56  ;;  %v1094_v63 = vmax.f32 %v1062_v57, 0.0  ;;  %v1066_v0 = vadd.f32 %v3845_v44, %v1031_v58  ;;  %v1067_v1 = vadd.f32 %v3845_v44, %v1032_v59 }
  0xd8   : > { %v1064_v30 = vadd.f32 %v3845_v44, %v1029_v12  ;;  %v1065_v31 = vadd.f32 %v3845_v44, %v1030_v14  ;;  %v1068_v22 = vadd.f32 %v3845_v44, %v1033_v16  ;;  %v1069_v24 = vadd.f32 %v3845_v44, %v1034_v17  ;;  %v3859_v34 = vpop.f32.mrf.mxu1 }
  0xd9   : > { %v1095_v5 = vmax.f32 %v1063_v62, 0.0  ;;  %v1126_v6 = vpack.c.bf16 %v1094_v63, %v1094_v63  ;;  %v1098_v7 = vmax.f32 %v1066_v0, 0.0  ;;  %v1099_v8 = vmax.f32 %v1067_v1, 0.0 }
  0xda   : > { %v1096_v36 = vmax.f32 %v1064_v30, 0.0  ;;  %v1097_v37 = vmax.f32 %v1065_v31, 0.0  ;;  %v1100_v39 = vmax.f32 %v1068_v22, 0.0  ;;  %v1101_v42 = vmax.f32 %v1069_v24, 0.0 }
  0xdb   : > { %v1127_v9 = vpack.c.bf16 %v1095_v5, %v1095_v5  ;;  %v1130_v10 = vpack.c.bf16 %v1098_v7, %v1098_v7  ;;  %v1131_v15 = vpack.c.bf16 %v1099_v8, %v1099_v8  ;;  %v1252_v19 = vunpack.c.l.b16 %v1126_v6 }
  0xdc   : > { %v942_v43 = vrot.slane %v3859_v34, 1  ;;  %v1128_v45 = vpack.c.bf16 %v1096_v36, %v1096_v36  ;;  %v1129_v46 = vpack.c.bf16 %v1097_v37, %v1097_v37  ;;  %v1132_v48 = vpack.c.bf16 %v1100_v39, %v1100_v39 }
  0xdd   : > { %v1253_v21 = vunpack.c.l.b16 %v1127_v9  ;;  %v1256_v26 = vunpack.c.l.b16 %v1130_v10  ;;  %v1257_v27 = vunpack.c.l.b16 %v1131_v15  ;;  %v1133_v49 = vpack.c.bf16 %v1101_v42, %v1101_v42 }
  0xde   : > { %v833_v32 = vpop.f32.mrf.mxu0  ;;  %v972_v50 = vperm.slane %v942_v43, 0  ;;  %v971_v51 = vperm.slane %v3859_v34, 0  ;;  %v1254_v52 = vunpack.c.l.b16 %v1128_v45  ;;  %v1255_v53 = vunpack.c.l.b16 %v1129_v46 }
  0xdf   : > { %v3851_v29 = vpack.c.b16 %v1253_v21, %v1252_v19  ;;  %v3855_v33 = vpack.c.b16 %v1257_v27, %v1256_v26  ;;  %v1258_v54 = vunpack.c.l.b16 %v1132_v48  ;;  %v1259_v55 = vunpack.c.l.b16 %v1133_v49 }
  0xe0   : > { %v1036_v56 = vadd.f32 %v972_v50, %v830_v2  ;;  %v1035_v57 = vadd.f32 %v971_v51, %v3840_v41  ;;  %v3868_v58 = vpack.c.b16 %v1255_v53, %v1254_v52  ;;  %v944_v0 = vrot.slane %v3859_v34, 3 }
  0xe1   : > { %3426 = vmatmul.msk.bf16.vlgmr.msra.gmra.mxu1 %vm1305_vm2, %v3851_v29  ;;  %3428 = vmatmul.msk.bf16.vlgmr.msra.gmra.mxu3 %vm1305_vm2, %v3855_v33  ;;  %v3870_v60 = vpack.c.b16 %v1259_v55, %v1258_v54  ;;  %v943_v41 = vrot.slane %v3859_v34, 2  ;;  %v946_v21 = vrot.slane %v3859_v34, 5  ;;  %v945_v27 = vrot.slane %v3859_v34, 4 }
  0xe2   : > { %v1071_v61 = vadd.f32 %v3845_v44, %v1036_v56  ;;  %v1070_v62 = vadd.f32 %v3845_v44, %v1035_v57  ;;  %v974_v4 = vperm.slane %v944_v0, 0  ;;  %v948_v49 = vrot.slane %v3859_v34, 7 }
  0xe3   : > { %v973_v6 = vperm.slane %v943_v41, 0  ;;  %v975_v24 = vperm.slane %v945_v27, 0  ;;  %v947_v51 = vrot.slane %v3859_v34, 6 }
  0xe4   : > { %v1103_v63 = vmax.f32 %v1071_v61, 0.0  ;;  %v1102_v1 = vmax.f32 %v1070_v62, 0.0  ;;  %v978_v53 = vperm.slane %v948_v49, 0 }
  0xe5   : > { %v1037_v9 = vadd.f32 %v973_v6, %v833_v32  ;;  %v976_v32 = vperm.slane %v946_v21, 0  ;;  %v977_v55 = vperm.slane %v947_v51, 0 }
  0xe6   : > { %v835_v47 = vpop.f32.mrf.mxu0  ;;  %v1135_v3 = vpack.c.bf16 %v1103_v63, %v1103_v63  ;;  %v1134_v5 = vpack.c.bf16 %v1102_v1, %v1102_v1  ;;  %v3902_v1 = vpop.f32.mrf.mxu1 }
  0xe7   : > { %v1038_v7 = vadd.f32 %v974_v4, %v835_v47  ;;  %v1072_v16 = vadd.f32 %v3845_v44, %v1037_v9  ;;  %v949_v41 = vrot.slane %v3902_v1, 1 }
  0xe8   : > { %v1261_v8 = vunpack.c.l.b16 %v1135_v3  ;;  %v1260_v10 = vunpack.c.l.b16 %v1134_v5  ;;  %v979_v5 = vperm.slane %v3902_v1, 0 }
  0xe9   : > { %v1073_v12 = vadd.f32 %v3845_v44, %v1038_v7  ;;  %v1104_v19 = vmax.f32 %v1072_v16, 0.0  ;;  %v980_v6 = vperm.slane %v949_v41, 0  ;;  %v3581_v7 = vld [vmem:[%s4628_s10] sm:$0xff] }
  0xea   : > { %v3881_v15 = vpack.c.b16 %v1261_v8, %v1260_v10  ;;  %1658 = vmatpush.bf16.msrb.mxu1 %v3581_v7 }
  0xeb   : > { %v1105_v17 = vmax.f32 %v1073_v12, 0.0  ;;  %v1136_v31 = vpack.c.bf16 %v1104_v19, %v1104_v19 }
  0xed   : > { %v1137_v26 = vpack.c.bf16 %v1105_v17, %v1105_v17  ;;  %v1262_v37 = vunpack.c.l.b16 %v1136_v31  ;;  %v950_v31 = vrot.slane %v3902_v1, 2 }
  0xee   : > { %v838_v59 = vpop.f32.mrf.mxu0 }
  0xef   : > { %v1263_v22 = vunpack.c.l.b16 %v1137_v26  ;;  %v1039_v39 = vadd.f32 %v975_v24, %v838_v59  ;;  %v3584_v26 = vld [vmem:[%s4633_s15] sm:$0xff] }
  0xf0   : > { %2271 = vmatpush.bf16.msrb.mxu0 %v3584_v26  ;;  %v954_v26 = vrot.slane %v3902_v1, 6 }
  0xf1   : > { %3427 = vmatmul.msk.bf16.gmra.mxu1 %vm1305_vm2, %v3868_v58  ;;  %3429 = vmatmul.msk.bf16.gmra.mxu3 %vm1305_vm2, %v3870_v60  ;;  %v3889_v43 = vpack.c.b16 %v1263_v22, %v1262_v37  ;;  %v1074_v45 = vadd.f32 %v3845_v44, %v1039_v39 }
  0xf3   : > { %v1106_v48 = vmax.f32 %v1074_v45, 0.0  ;;  %3492 = vmatmul.msk.bf16.vlgmr.msrb.gmra.mxu0 %vm750_vm0, %v3787_v11 }
  0xf5   : > { %v1138_v52 = vpack.c.bf16 %v1106_v48, %v1106_v48 }
  0xf6   : > { %v840_v2 = vpop.f32.mrf.mxu0 }
  0xf7   : > { %v1040_v36 = vadd.f32 %v976_v32, %v840_v2  ;;  %v1264_v59 = vunpack.c.l.b16 %v1138_v52  ;;  %v951_v32 = vrot.slane %v3902_v1, 3 }
  0xf9   : > { %v1075_v42 = vadd.f32 %v3845_v44, %v1040_v36  ;;  %v981_v36 = vperm.slane %v950_v31, 0  ;;  %v982_v37 = vperm.slane %v951_v32, 0 }
  0xfb   : > { %v1107_v47 = vmax.f32 %v1075_v42, 0.0 }
  0xfd   : > { %v1139_v50 = vpack.c.bf16 %v1107_v47, %v1107_v47 }
  0xfe   : > { %v843_v14 = vpop.f32.mrf.mxu0 }
  0xff   : > { %v1265_v54 = vunpack.c.l.b16 %v1139_v50  ;;  %v1041_v61 = vadd.f32 %v977_v55, %v843_v14  ;;  %v3450_v55 = vld [vmem:[%s4626_s8] sm:$0xf] }
 0x101   : > { %3430 = vmatmul.msk.bf16.gmra.mxu3 %vm1305_vm2, %v3881_v15  ;;  %v3897_v63 = vpack.c.b16 %v1265_v54, %v1264_v59  ;;  %v1076_v0 = vadd.f32 %v3845_v44, %v1041_v61  ;;  %3446 = vmatmul.msk.bf16.vlgmr.msrb.gmra.mxu1 %vm750_vm0, %v3787_v11  ;;  %v953_v54 = vrot.slane %v3902_v1, 5 }
 0x103   : > { %v1108_v2 = vmax.f32 %v1076_v0, 0.0  ;;  %3493 = vmatmul.msk.bf16.gmra.mxu0 %vm750_vm0, %v3793_v13  ;;  %v984_v0 = vperm.slane %v953_v54, 0 }
 0x105   : > { %v1140_v8 = vpack.c.bf16 %v1108_v2, %v1108_v2 }
 0x106   : > { %v845_v30 = vpop.f32.mrf.mxu0 }
 0x107   : > { %v1042_v56 = vadd.f32 %v978_v53, %v845_v30  ;;  %v1266_v14 = vunpack.c.l.b16 %v1140_v8  ;;  %v952_v53 = vrot.slane %v3902_v1, 4 }
 0x109   : > { %v1077_v62 = vadd.f32 %v3845_v44, %v1042_v56  ;;  %v3582_v56 = vld [vmem:[%s4626_s8] sm:$0x30] }
 0x10a   : > { %v3451_v61 = vor.u32 %v3582_v56, %v3450_v55 }
 0x10b   : > { %v1109_v34 = vmax.f32 %v1077_v62, 0.0  ;;  %v983_v62 = vperm.slane %v952_v53, 0 }
 0x10d   : > { %v1141_v4 = vpack.c.bf16 %v1109_v34, %v1109_v34  ;;  %v1838_v34 = vsel %vm1354_vm1, %v3451_v61, 0 }
 0x10e   : > { %v848_v46 = vpop.f32.mrf.mxu0  ;;  %1847 = vmatpush.bf16.msra.mxu1 %v1838_v34  ;;  %3590 = vmatpush.bf16.msrb.mxu2 %v1838_v34 }
 0x10f   : > { %v1267_v9 = vunpack.c.l.b16 %v1141_v4  ;;  %v1043_v10 = vadd.f32 %v979_v5, %v848_v46 }
 0x111   : > { %3431 = vmatmul.msk.bf16.gmra.mxu3 %vm1305_vm2, %v3889_v43  ;;  %v1078_v16 = vadd.f32 %v3845_v44, %v1043_v10  ;;  %v3913_v19 = vpack.c.b16 %v1267_v9, %v1266_v14  ;;  %3447 = vmatmul.msk.bf16.gmra.mxu1 %vm750_vm0, %v3793_v13  ;;  %v3516_v9 = vld [vmem:[%s4631_s13] sm:$0xf]  ;;  %v3586_v10 = vld [vmem:[%s4631_s13] sm:$0x30] }
 0x113   : > { %v1110_v27 = vmax.f32 %v1078_v16, 0.0  ;;  %v955_v16 = vrot.slane %v3902_v1, 7  ;;  %v3496_v1 = vld [vmem:[%s4630_s12] sm:$0xf] }
 0x115   : > { %v1142_v22 = vpack.c.bf16 %v1110_v27, %v1110_v27  ;;  %v3959_v27 = vpop.f32.mrf.mxu2 }
 0x116   : > { %v850_v57 = vpop.f32.mrf.mxu0 }
 0x117   : > { %v1044_v12 = vadd.f32 %v980_v6, %v850_v57  ;;  %v1268_v42 = vunpack.c.l.b16 %v1142_v22  ;;  %v986_v22 = vperm.slane %v955_v16, 0 }
 0x119   : > { %v1079_v17 = vadd.f32 %v3845_v44, %v1044_v12  ;;  %v3955_v12 = vpop.f32.mrf.mxu1 }
 0x11a   : > { %v956_v61 = vrot.slane %v3955_v12, 1 }
 0x11b   : > { %v1111_v30 = vmax.f32 %v1079_v17, 0.0  ;;  %v3517_v17 = vor.u32 %v3586_v10, %v3516_v9 }
 0x11d   : > { %v1143_v24 = vpack.c.bf16 %v1111_v30, %v1111_v30  ;;  %v2646_v30 = vsel %vm1354_vm1, %v3517_v17, 0 }
 0x11e   : > { %v853_v3 = vpop.f32.mrf.mxu0  ;;  %2655 = vmatpush.bf16.msra.mxu0 %v2646_v30 }
 0x11f   : > { %v1269_v45 = vunpack.c.l.b16 %v1143_v24  ;;  %v1045_v46 = vadd.f32 %v981_v36, %v853_v3  ;;  %v1447_v24 = vperm.slane %v3959_v27, 0 }
 0x121   : > { %3432 = vmatmul.msk.bf16.gmra.mxu3 %vm1305_vm2, %v3897_v63  ;;  %v1080_v48 = vadd.f32 %v3845_v44, %v1045_v46  ;;  %v3928_v50 = vpack.c.b16 %v1269_v45, %v1268_v42 }
 0x123   : > { %v1112_v11 = vmax.f32 %v1080_v48, 0.0 }
 0x125   : > { %v1144_v57 = vpack.c.bf16 %v1112_v11, %v1112_v11  ;;  %v1190_v11 = vrot.slane %v3959_v27, 1 }
 0x126   : > { %v855_v21 = vpop.f32.mrf.mxu0 }
 0x127   : > { %v1046_v47 = vadd.f32 %v982_v37, %v855_v21  ;;  %v1270_v41 = vunpack.c.l.b16 %v1144_v57  ;;  %v985_v37 = vperm.slane %v954_v26, 0  ;;  %v1448_v57 = vperm.slane %v1190_v11, 0 }
 0x129   : > { %v1081_v49 = vadd.f32 %v3845_v44, %v1046_v47  ;;  %v3585_v47 = vld [vmem:[%s4630_s12] sm:$0x30] }
 0x12b   : > { %v1113_v51 = vmax.f32 %v1081_v49, 0.0  ;;  %v3972_v49 = vld [vmem:[%s4625_s7] ss:$0 sm:$0xff] }
 0x12d   : > { %v1145_v59 = vpack.c.bf16 %v1113_v51, %v1113_v51  ;;  %v3497_v51 = vor.u32 %v3585_v47, %v3496_v1 }
 0x12e   : > { %v858_v39 = vpop.f32.mrf.mxu0 }
 0x12f   : > { %v1271_v2 = vunpack.c.l.b16 %v1145_v59  ;;  %v1047_v3 = vadd.f32 %v983_v62, %v858_v39  ;;  %v2451_v54 = vsel %vm1354_vm1, %v3497_v51, 0 }
 0x130   : > { %2460 = vmatpush.bf16.msrb.mxu3 %v2451_v54  ;;  %v958_v54 = vrot.slane %v3955_v12, 3 }
 0x131   : > { %3433 = vmatmul.msk.bf16.gmra.mxu3 %vm1305_vm2, %v3913_v19  ;;  %v3944_v6 = vpack.c.b16 %v1271_v2, %v1270_v41  ;;  %v1082_v7 = vadd.f32 %v3845_v44, %v1047_v3 }
 0x133   : > { %v1114_v14 = vmax.f32 %v1082_v7, 0.0  ;;  %v3583_v7 = vld [vmem:[%s4627_s9] sm:$0x30] }
 0x135   : > { %v1146_v32 = vpack.c.bf16 %v1114_v14, %v1114_v14  ;;  %v987_v14 = vperm.slane %v3955_v12, 0 }
 0x136   : > { %v860_v52 = vpop.f32.mrf.mxu0 }
 0x137   : > { %v1048_v13 = vadd.f32 %v984_v0, %v860_v52  ;;  %v1272_v42 = vunpack.c.l.b16 %v1146_v32 }
 0x139   : > { %v1083_v5 = vadd.f32 %v3845_v44, %v1048_v13  ;;  %v1191_v13 = vrot.slane %v3959_v27, 2 }
 0x13b   : > { %v1115_v8 = vmax.f32 %v1083_v5, 0.0  ;;  %v3470_v5 = vld [vmem:[%s4627_s9] sm:$0xf] }
 0x13c   : > { %v3471_v9 = vor.u32 %v3583_v7, %v3470_v5 }
 0x13d   : > { %v1147_v21 = vpack.c.bf16 %v1115_v8, %v1115_v8 }
 0x13e   : > { %v863_v4 = vpop.f32.mrf.mxu0  ;;  %v2033_v26 = vsel %vm1354_vm1, %v3471_v9, 0 }
 0x13f   : > { %v1273_v36 = vunpack.c.l.b16 %v1147_v21  ;;  %v1049_v45 = vadd.f32 %v985_v37, %v863_v4  ;;  %v988_v4 = vperm.slane %v956_v61, 0  ;;  %v1449_v21 = vperm.slane %v1191_v13, 0  ;;  %2042 = vmatpush.bf16.msrb.mxu1 %v2033_v26 }
 0x140   : > { %v1051_v37 = vadd.f32 %v987_v14, %v3803_v18  ;;  %v1193_v61 = vrot.slane %v3959_v27, 4  ;;  %v990_v13 = vperm.slane %v958_v54, 0 }
 0x141   : > { %3434 = vmatmul.msk.bf16.gmra.mxu3 %vm1305_vm2, %v3928_v50  ;;  %v3976_v53 = vpack.c.b16 %v1273_v36, %v1272_v42  ;;  %v1084_v55 = vadd.f32 %v3845_v44, %v1049_v45 }
 0x142   : > { %v1451_v7 = vperm.slane %v1193_v61, 0  ;;  %v1195_v61 = vrot.slane %v3959_v27, 6 }
 0x143   : > { %v1116_v0 = vmax.f32 %v1084_v55, 0.0  ;;  %v1194_v55 = vrot.slane %v3959_v27, 5 }
 0x145   : > { %v1148_v10 = vpack.c.bf16 %v1116_v0, %v1116_v0 }
 0x146   : > { %v865_v31 = vpop.f32.mrf.mxu0 }
 0x147   : > { %v1050_v39 = vadd.f32 %v986_v22, %v865_v31  ;;  %v1052_v31 = vadd.f32 %v988_v4, %v3806_v20  ;;  %v1086_v20 = vadd.f32 %v3845_v44, %v1051_v37 }
 0x149   : > { %v1085_v52 = vadd.f32 %v3845_v44, %v1050_v39  ;;  %v1087_v47 = vadd.f32 %v3845_v44, %v1052_v31  ;;  %v3536_v31 = vld [vmem:[%s4632_s14] sm:$0xf] }
 0x14b   : > { %v1117_v59 = vmax.f32 %v1085_v52, 0.0  ;;  %v1119_v51 = vmax.f32 %v1087_v47, 0.0  ;;  %v957_v52 = vrot.slane %v3955_v12, 2 }
 0x14d   : > { %v1149_v3 = vpack.c.bf16 %v1117_v59, %v1117_v59  ;;  %v1118_v59 = vmax.f32 %v1086_v20, 0.0  ;;  %v960_v20 = vrot.slane %v3955_v12, 5 }
 0x14f   : > { %v1275_v30 = vunpack.c.l.b16 %v1149_v3  ;;  %v1452_v3 = vperm.slane %v1194_v55, 0  ;;  %v1150_v5 = vpack.c.bf16 %v1118_v59, %v1118_v59 }
 0x151   : > { %3435 = vmatmul.msk.bf16.gmra.mxu3 %vm1305_vm2, %v3944_v6 }
 0x15e   : > { %v1367_v46 = vpop.f32.mrf.mxu1 }
 0x15f   : > { %v1511_v48 = vadd.f32 %v1447_v24, %v1367_v46  ;;  %v1274_v24 = vunpack.c.l.b16 %v1148_v10  ;;  %v1192_v46 = vrot.slane %v3959_v27, 3 }
 0x161   : > { %3436 = vmatmul.msk.bf16.gmra.mxu3 %vm1305_vm2, %v3976_v53  ;;  %v1546_v56 = vadd.f32 %v3972_v49, %v1511_v48  ;;  %v3999_v1 = vpack.c.b16 %v1275_v30, %v1274_v24  ;;  %v1450_v18 = vperm.slane %v1192_v46, 0  ;;  %v1276_v30 = vunpack.c.l.b16 %v1150_v5 }
 0x163   : > { %v1578_v41 = vmax.f32 %v1546_v56, 0.0 }
 0x164   : > { %v3984_v62 = vpop.f32.mrf.mxu3 }
 0x165   : > { %v1610_v16 = vpack.c.bf16 %v1578_v41, %v1578_v41  ;;  %v1151_v41 = vpack.c.bf16 %v1119_v51, %v1119_v51  ;;  %v1515_v24 = vadd.f32 %v1451_v7, %v3984_v62  ;;  %v959_v62 = vrot.slane %v3955_v12, 4 }
 0x166   : > { %v1369_v34 = vpop.f32.mrf.mxu1 }
 0x167   : > { %v1512_v2 = vadd.f32 %v1448_v57, %v1369_v34  ;;  %v1736_v39 = vunpack.c.l.b16 %v1610_v16  ;;  %v1277_v10 = vunpack.c.l.b16 %v1151_v41  ;;  %v1054_v16 = vadd.f32 %v990_v13, %v3812_v25 }
 0x169   : > { %v1547_v8 = vadd.f32 %v3972_v49, %v1512_v2  ;;  %v989_v2 = vperm.slane %v957_v52, 0 }
 0x16b   : > { %v1579_v17 = vmax.f32 %v1547_v8, 0.0  ;;  %v1053_v14 = vadd.f32 %v989_v2, %v3809_v23  ;;  %v4024_v23 = vpack.c.b16 %v1277_v10, %v1276_v30 }
 0x16c   : > { %v1379_v22 = vpop.f32.mrf.mxu3 }
 0x16d   : > { %v1611_v32 = vpack.c.bf16 %v1579_v17, %v1579_v17  ;;  %v1516_v17 = vadd.f32 %v1452_v3, %v1379_v22  ;;  %v1088_v25 = vadd.f32 %v3845_v44, %v1053_v14  ;;  %v1089_v22 = vadd.f32 %v3845_v44, %v1054_v16 }
 0x16e   : > { %v1372_v36 = vpop.f32.mrf.mxu1 }
 0x16f   : > { %v1737_v42 = vunpack.c.l.b16 %v1611_v32  ;;  %v1513_v45 = vadd.f32 %v1449_v21, %v1372_v36  ;;  %v3587_v32 = vld [vmem:[%s4632_s14] sm:$0x30]  ;;  %v1121_v51 = vmax.f32 %v1089_v22, 0.0 }
 0x171   : > { %v1768_v48 = vpack.c.b16 %v1737_v42, %v1736_v39  ;;  %3437 = vmatmul.msk.bf16.gmra.mxu3 %vm1305_vm2, %v3999_v1  ;;  %v1548_v11 = vadd.f32 %v3972_v49, %v1513_v45  ;;  %v3537_v39 = vor.u32 %v3587_v32, %v3536_v31  ;;  %v1551_v42 = vadd.f32 %v3972_v49, %v1516_v17  ;;  %v4029_v45 = vpop.f32.mrf.mxu2 }
 0x172   : > { %v1197_v41 = vrot.slane %v4029_v45, 1  ;;  %v1153_v13 = vpack.c.bf16 %v1121_v51, %v1121_v51 }
 0x173   : > { %3452 = vmatmul.msk.bf16.vlgmr.msra.gmra.mxu1 %vm1305_vm2, %v1768_v48  ;;  %3518 = vmatmul.msk.bf16.vlgmr.msra.gmra.mxu0 %vm1305_vm2, %v1768_v48  ;;  %v1580_v0 = vmax.f32 %v1548_v11, 0.0  ;;  %v2777_v47 = vsel %vm1354_vm1, %v3537_v39, 0  ;;  %v1550_v48 = vadd.f32 %v3972_v49, %v1515_v24  ;;  %v1455_v11 = vperm.slane %v4029_v45, 0 }
 0x174   : > { %v4011_v56 = vpop.f32.mrf.mxu3  ;;  %2786 = vmatpush.bf16.msra.mxu2 %v2777_v47  ;;  %v1583_v52 = vmax.f32 %v1551_v42, 0.0  ;;  %v1456_v14 = vperm.slane %v1197_v41, 0  ;;  %v1279_v17 = vunpack.c.l.b16 %v1153_v13  ;;  %v1199_v41 = vrot.slane %v4029_v45, 3 }
 0x175   : > { %v1612_v8 = vpack.c.bf16 %v1580_v0, %v1580_v0  ;;  %v1582_v59 = vmax.f32 %v1550_v48, 0.0  ;;  %v1196_v0 = vrot.slane %v3959_v27, 7 }
 0x176   : > { %v1374_v57 = vpop.f32.mrf.mxu1  ;;  %v1615_v3 = vpack.c.bf16 %v1583_v52, %v1583_v52 }
 0x177   : > { %v1514_v34 = vadd.f32 %v1450_v18, %v1374_v57  ;;  %v1738_v36 = vunpack.c.l.b16 %v1612_v8  ;;  %v1120_v18 = vmax.f32 %v1088_v25, 0.0  ;;  %v991_v57 = vperm.slane %v959_v62, 0 }
 0x178   : > { %v1614_v7 = vpack.c.bf16 %v1582_v59, %v1582_v59  ;;  %v1453_v8 = vperm.slane %v1195_v61, 0 }
 0x179   : > { %v1549_v4 = vadd.f32 %v3972_v49, %v1514_v34  ;;  %v992_v34 = vperm.slane %v960_v20, 0  ;;  %v1152_v2 = vpack.c.bf16 %v1120_v18, %v1120_v18  ;;  %v1055_v5 = vadd.f32 %v991_v57, %v3815_v28 }
 0x17a   : > { %v1740_v24 = vunpack.c.l.b16 %v1614_v7  ;;  %v962_v18 = vrot.slane %v3955_v12, 7 }
 0x17b   : > { %v1581_v9 = vmax.f32 %v1549_v4, 0.0  ;;  %v1056_v10 = vadd.f32 %v992_v34, %v3830_v35  ;;  %v1278_v16 = vunpack.c.l.b16 %v1152_v2  ;;  %v1198_v35 = vrot.slane %v4029_v45, 2 }
 0x17c   : > { %v1384_v26 = vpop.f32.mrf.mxu3  ;;  %v994_v13 = vperm.slane %v962_v18, 0 }
 0x17d   : > { %v1613_v21 = vpack.c.bf16 %v1581_v9, %v1581_v9  ;;  %v1454_v9 = vperm.slane %v1196_v0, 0  ;;  %v1091_v28 = vadd.f32 %v3845_v44, %v1056_v10  ;;  %v4050_v25 = vpack.c.b16 %v1279_v17, %v1278_v16 }
 0x17e   : > { %v1457_v20 = vperm.slane %v1198_v35, 0  ;;  %v1058_v10 = vadd.f32 %v994_v13, %v3838_v40 }
 0x17f   : > { %v1739_v37 = vunpack.c.l.b16 %v1613_v21  ;;  %v1741_v21 = vunpack.c.l.b16 %v1615_v3  ;;  %v1518_v27 = vadd.f32 %v1454_v9, %v1384_v26  ;;  %v1123_v62 = vmax.f32 %v1091_v28, 0.0 }
 0x181   : > { %v1769_v46 = vpack.c.b16 %v1739_v37, %v1738_v36  ;;  %3438 = vmatmul.msk.bf16.gmra.mxu3 %vm1305_vm2, %v4024_v23  ;;  %v1517_v36 = vadd.f32 %v1453_v8, %v4011_v56  ;;  %v1090_v37 = vadd.f32 %v3845_v44, %v1055_v5  ;;  %v1770_v22 = vpack.c.b16 %v1741_v21, %v1740_v24 }
 0x182   : > { %v1553_v42 = vadd.f32 %v3972_v49, %v1518_v27  ;;  %v1155_v0 = vpack.c.bf16 %v1123_v62, %v1123_v62  ;;  %v1458_v8 = vperm.slane %v1199_v41, 0 }
 0x183   : > { %3453 = vmatmul.msk.bf16.gmra.mxu1 %vm1305_vm2, %v1769_v46  ;;  %3519 = vmatmul.msk.bf16.gmra.mxu0 %vm1305_vm2, %v1769_v46  ;;  %v1552_v56 = vadd.f32 %v3972_v49, %v1517_v36  ;;  %v1122_v47 = vmax.f32 %v1090_v37, 0.0  ;;  %v1093_v36 = vadd.f32 %v3845_v44, %v1058_v10 }
 0x184   : > { %v1387_v54 = vpop.f32.mrf.mxu3  ;;  %v1585_v51 = vmax.f32 %v1553_v42, 0.0  ;;  %v1281_v7 = vunpack.c.l.b16 %v1155_v0 }
 0x185   : > { %v1519_v55 = vadd.f32 %v1455_v11, %v1387_v54  ;;  %v961_v11 = vrot.slane %v3955_v12, 6  ;;  %v1584_v59 = vmax.f32 %v1552_v56, 0.0  ;;  %v1154_v61 = vpack.c.bf16 %v1122_v47, %v1122_v47 }
 0x186   : > { %v1617_v3 = vpack.c.bf16 %v1585_v51, %v1585_v51 }
 0x187   : > { %v1554_v4 = vadd.f32 %v3972_v49, %v1519_v55  ;;  %v993_v2 = vperm.slane %v961_v11, 0  ;;  %v1616_v5 = vpack.c.bf16 %v1584_v59, %v1584_v59  ;;  %v1280_v12 = vunpack.c.l.b16 %v1154_v61 }
 0x188   : > { %v1202_v61 = vrot.slane %v4029_v45, 6 }
 0x189   : > { %v1586_v31 = vmax.f32 %v1554_v4, 0.0  ;;  %v1057_v9 = vadd.f32 %v993_v2, %v3833_v38  ;;  %v1742_v27 = vunpack.c.l.b16 %v1616_v5 }
 0x18a   : > { %v1461_v13 = vperm.slane %v1202_v61, 0 }
 0x18b   : > { %v1618_v26 = vpack.c.bf16 %v1586_v31, %v1586_v31  ;;  %v1092_v24 = vadd.f32 %v3845_v44, %v1057_v9  ;;  %v1201_v44 = vrot.slane %v4029_v45, 5 }
 0x18c   : > { %v1389_v30 = vpop.f32.mrf.mxu3 }
 0x18d   : > { %v1520_v32 = vadd.f32 %v1456_v14, %v1389_v30  ;;  %v1744_v54 = vunpack.c.l.b16 %v1618_v26  ;;  %v1743_v14 = vunpack.c.l.b16 %v1617_v3  ;;  %v4066_v30 = vpack.c.b16 %v1281_v7, %v1280_v12 }
 0x18e   : > { %v1124_v35 = vmax.f32 %v1092_v24, 0.0  ;;  %v1460_v11 = vperm.slane %v1201_v44, 0 }
 0x18f   : > { %v1555_v39 = vadd.f32 %v3972_v49, %v1520_v32  ;;  %v1200_v32 = vrot.slane %v4029_v45, 4  ;;  %v1771_v37 = vpack.c.b16 %v1743_v14, %v1742_v27 }
 0x190   : > { %v1156_v62 = vpack.c.bf16 %v1124_v35, %v1124_v35 }
 0x191   : > { %v1587_v46 = vmax.f32 %v1555_v39, 0.0  ;;  %3439 = vmatmul.msk.bf16.gmra.mxu3 %vm1305_vm2, %v4050_v25  ;;  %v1459_v39 = vperm.slane %v1200_v32, 0 }
 0x192   : > { %v1282_v18 = vunpack.c.l.b16 %v1156_v62 }
 0x193   : > { %3454 = vmatmul.msk.bf16.gmra.mxu1 %vm1305_vm2, %v1770_v22  ;;  %3520 = vmatmul.msk.bf16.gmra.mxu0 %vm1305_vm2, %v1770_v22  ;;  %v1619_v48 = vpack.c.bf16 %v1587_v46, %v1587_v46  ;;  %v1125_v22 = vmax.f32 %v1093_v36, 0.0 }
 0x194   : > { %v1392_v52 = vpop.f32.mrf.mxu3 }
 0x195   : > { %v1745_v55 = vunpack.c.l.b16 %v1619_v48  ;;  %v1521_v57 = vadd.f32 %v1457_v20, %v1392_v52  ;;  %v1157_v48 = vpack.c.bf16 %v1125_v22, %v1125_v22 }
 0x197   : > { %v1772_v34 = vpack.c.b16 %v1745_v55, %v1744_v54  ;;  %v1556_v4 = vadd.f32 %v3972_v49, %v1521_v57  ;;  %v1283_v51 = vunpack.c.l.b16 %v1157_v48 }
 0x199   : > { %3456 = vmatmul.msk.bf16.vlgmr.msrb.gmra.mxu2 %vm1305_vm2, %v1772_v34  ;;  %v1588_v17 = vmax.f32 %v1556_v4, 0.0  ;;  %v4080_v59 = vpack.c.b16 %v1283_v51, %v1282_v18 }
 0x19b   : > { %v1620_v28 = vpack.c.bf16 %v1588_v17, %v1588_v17 }
 0x19c   : > { %v1394_v16 = vpop.f32.mrf.mxu3 }
 0x19d   : > { %v1522_v21 = vadd.f32 %v1458_v8, %v1394_v16  ;;  %v1746_v26 = vunpack.c.l.b16 %v1620_v28  ;;  %v1203_v8 = vrot.slane %v4029_v45, 7 }
 0x19f   : > { %v1557_v31 = vadd.f32 %v3972_v49, %v1522_v21  ;;  %v1462_v10 = vperm.slane %v1203_v8, 0 }
 0x1a1   : > { %v1589_v38 = vmax.f32 %v1557_v31, 0.0  ;;  %3440 = vmatmul.msk.bf16.gmra.mxu3 %vm1305_vm2, %v4066_v30 }
 0x1a3   : > { %3455 = vmatmul.msk.bf16.gmra.mxu1 %vm1305_vm2, %v1771_v37  ;;  %3521 = vmatmul.msk.bf16.gmra.mxu0 %vm1305_vm2, %v1771_v37  ;;  %v1621_v40 = vpack.c.bf16 %v1589_v38, %v1589_v38 }
 0x1a4   : > { %v1397_v42 = vpop.f32.mrf.mxu3 }
 0x1a5   : > { %v1747_v46 = vunpack.c.l.b16 %v1621_v40  ;;  %v1523_v56 = vadd.f32 %v1459_v39, %v1397_v42  ;;  %v4099_v39 = vpop.f32.mrf.mxu1 }
 0x1a7   : > { %v1773_v47 = vpack.c.b16 %v1747_v46, %v1746_v26  ;;  %v1558_v20 = vadd.f32 %v3972_v49, %v1523_v56 }
 0x1a9   : > { %3457 = vmatmul.msk.bf16.gmra.mxu2 %vm1305_vm2, %v1773_v47  ;;  %v1590_v54 = vmax.f32 %v1558_v20, 0.0 }
 0x1ab   : > { %v1622_v0 = vpack.c.bf16 %v1590_v54, %v1590_v54 }
 0x1ac   : > { %v1399_v52 = vpop.f32.mrf.mxu3 }
 0x1ad   : > { %v1524_v55 = vadd.f32 %v1460_v11, %v1399_v52  ;;  %v1748_v4 = vunpack.c.l.b16 %v1622_v0  ;;  %v4105_v48 = vpop.f32.mrf.mxu1 }
 0x1af   : > { %v1559_v57 = vadd.f32 %v3972_v49, %v1524_v55 }
 0x1b1   : > { %v1591_v41 = vmax.f32 %v1559_v57, 0.0  ;;  %3441 = vmatmul.msk.bf16.gmra.mxu3 %vm1305_vm2, %v4080_v59 }
 0x1b3   : > { %3472 = vmatmul.msk.bf16.vlgmr.msrb.gmra.mxu1 %vm1305_vm2, %v3851_v29  ;;  %3522 = vmatmul.msk.bf16.gmra.mxu0 %vm1305_vm2, %v1772_v34  ;;  %v1623_v2 = vpack.c.bf16 %v1591_v41, %v1591_v41  ;;  %v4092_v34 = vpop.f32.mrf.mxu2 }
 0x1b4   : > { %v1402_v3 = vpop.f32.mrf.mxu3  ;;  %v1463_v32 = vperm.slane %v4092_v34, 0  ;;  %v1204_v38 = vrot.slane %v4092_v34, 1  ;;  %v1206_v57 = vrot.slane %v4092_v34, 3 }
 0x1b5   : > { %v1749_v5 = vunpack.c.l.b16 %v1623_v2  ;;  %v1525_v12 = vadd.f32 %v1461_v13, %v1402_v3  ;;  %v4113_v41 = vpop.f32.mrf.mxu1 }
 0x1b6   : > { %v1464_v22 = vperm.slane %v1204_v38, 0  ;;  %v1466_v0 = vperm.slane %v1206_v57, 0  ;;  %v1675_v57 = vrot.slane %v4099_v39, 2 }
 0x1b7   : > { %v1774_v7 = vpack.c.b16 %v1749_v5, %v1748_v4  ;;  %v1560_v9 = vadd.f32 %v3972_v49, %v1525_v12  ;;  %v1207_v5 = vrot.slane %v4092_v34, 4 }
 0x1b9   : > { %3458 = vmatmul.msk.bf16.gmra.mxu2 %vm1305_vm2, %v1774_v7  ;;  %v1592_v16 = vmax.f32 %v1560_v9, 0.0  ;;  %v1467_v9 = vperm.slane %v1207_v5, 0 }
 0x1bb   : > { %v1624_v27 = vpack.c.bf16 %v1592_v16, %v1592_v16 }
 0x1bc   : > { %v1404_v14 = vpop.f32.mrf.mxu3 }
 0x1bd   : > { %v1526_v17 = vadd.f32 %v1462_v10, %v1404_v14  ;;  %v1750_v36 = vunpack.c.l.b16 %v1624_v27 }
 0x1bf   : > { %v1561_v21 = vadd.f32 %v3972_v49, %v1526_v17 }
 0x1c1   : > { %v1593_v31 = vmax.f32 %v1561_v21, 0.0  ;;  %v4120_v21 = vpop.f32.mrf.mxu1 }
 0x1c3   : > { %3473 = vmatmul.msk.bf16.gmra.mxu1 %vm1305_vm2, %v3868_v58  ;;  %3523 = vmatmul.msk.bf16.gmra.mxu0 %vm1305_vm2, %v1773_v47  ;;  %v1625_v45 = vpack.c.bf16 %v1593_v31, %v1593_v31  ;;  %v1205_v47 = vrot.slane %v4092_v34, 2  ;;  %v1208_v31 = vrot.slane %v4092_v34, 5 }
 0x1c4   : > { %v1407_v24 = vpop.f32.mrf.mxu3 }
 0x1c5   : > { %v1751_v37 = vunpack.c.l.b16 %v1625_v45  ;;  %v1527_v28 = vadd.f32 %v1463_v32, %v1407_v24  ;;  %v1465_v11 = vperm.slane %v1205_v47, 0  ;;  %v1468_v45 = vperm.slane %v1208_v31, 0 }
 0x1c7   : > { %v1775_v40 = vpack.c.b16 %v1751_v37, %v1750_v36  ;;  %v1562_v35 = vadd.f32 %v3972_v49, %v1527_v28  ;;  %v1929_v28 = vperm.slane %v4099_v39, 0 }
 0x1c9   : > { %3459 = vmatmul.msk.bf16.gmra.mxu2 %vm1305_vm2, %v1775_v40  ;;  %v1594_v26 = vmax.f32 %v1562_v35, 0.0  ;;  %v1209_v35 = vrot.slane %v4092_v34, 6 }
 0x1cb   : > { %v1626_v44 = vpack.c.bf16 %v1594_v26, %v1594_v26  ;;  %v1469_v47 = vperm.slane %v1209_v35, 0 }
 0x1cc   : > { %v1409_v42 = vpop.f32.mrf.mxu3 }
 0x1cd   : > { %v1528_v46 = vadd.f32 %v1464_v22, %v1409_v42  ;;  %v1752_v51 = vunpack.c.l.b16 %v1626_v44 }
 0x1cf   : > { %v1563_v56 = vadd.f32 %v3972_v49, %v1528_v46  ;;  %v4133_v46 = vpop.f32.mrf.mxu0 }
 0x1d1   : > { %v1595_v62 = vmax.f32 %v1563_v56, 0.0 }
 0x1d3   : > { %3474 = vmatmul.msk.bf16.gmra.mxu1 %vm1305_vm2, %v3855_v33  ;;  %3524 = vmatmul.msk.bf16.gmra.mxu0 %vm1305_vm2, %v1774_v7  ;;  %v1627_v20 = vpack.c.bf16 %v1595_v62, %v1595_v62 }
 0x1d4   : > { %v1412_v18 = vpop.f32.mrf.mxu3 }
 0x1d5   : > { %v1753_v52 = vunpack.c.l.b16 %v1627_v20  ;;  %v1529_v54 = vadd.f32 %v1465_v11, %v1412_v18 }
 0x1d7   : > { %v1776_v55 = vpack.c.b16 %v1753_v52, %v1752_v51  ;;  %v1564_v61 = vadd.f32 %v3972_v49, %v1529_v54  ;;  %v1210_v52 = vrot.slane %v4092_v34, 7 }
 0x1d9   : > { %3460 = vmatmul.msk.bf16.gmra.mxu2 %vm1305_vm2, %v1776_v55  ;;  %v1596_v13 = vmax.f32 %v1564_v61, 0.0 }
 0x1db   : > { %v1628_v12 = vpack.c.bf16 %v1596_v13, %v1596_v13 }
 0x1dc   : > { %v1414_v2 = vpop.f32.mrf.mxu3 }
 0x1dd   : > { %v1530_v3 = vadd.f32 %v1466_v0, %v1414_v2  ;;  %v1754_v14 = vunpack.c.l.b16 %v1628_v12  ;;  %v4141_v0 = vpop.f32.mrf.mxu0  ;;  %v4144_v12 = vpop.f32.mrf.mxu2 }
 0x1df   : > { %v1565_v4 = vadd.f32 %v3972_v49, %v1530_v3  ;;  %v1931_v3 = vperm.slane %v1675_v57, 0 }
 0x1e1   : > { %v1597_v7 = vmax.f32 %v1565_v4, 0.0 }
 0x1e3   : > { %3475 = vmatmul.msk.bf16.gmra.mxu1 %vm1305_vm2, %v3870_v60  ;;  %3525 = vmatmul.msk.bf16.gmra.mxu0 %vm1305_vm2, %v1775_v40  ;;  %v1629_v8 = vpack.c.bf16 %v1597_v7, %v1597_v7 }
 0x1e4   : > { %v1417_v10 = vpop.f32.mrf.mxu3 }
 0x1e5   : > { %v1755_v16 = vunpack.c.l.b16 %v1629_v8  ;;  %v1531_v17 = vadd.f32 %v1467_v9, %v1417_v10  ;;  %v1471_v10 = vperm.slane %v4144_v12, 0 }
 0x1e7   : > { %v1777_v27 = vpack.c.b16 %v1755_v16, %v1754_v14  ;;  %v1566_v32 = vadd.f32 %v3972_v49, %v1531_v17 }
 0x1e9   : > { %3461 = vmatmul.msk.bf16.gmra.mxu2 %vm1305_vm2, %v1777_v27  ;;  %v1598_v36 = vmax.f32 %v1566_v32, 0.0  ;;  %v4152_v32 = vpop.f32.mrf.mxu0 }
 0x1eb   : > { %v1630_v42 = vpack.c.bf16 %v1598_v36, %v1598_v36  ;;  %v1211_v36 = vrot.slane %v4144_v12, 1 }
 0x1ec   : > { %v1419_v24 = vpop.f32.mrf.mxu3 }
 0x1ed   : > { %v1532_v37 = vadd.f32 %v1468_v45, %v1419_v24  ;;  %v1756_v62 = vunpack.c.l.b16 %v1630_v42 }
 0x1ef   : > { %v1567_v38 = vadd.f32 %v3972_v49, %v1532_v37 }
 0x1f0   : > { %v1849_v40 = vpop.f32.mrf.mxu1 }
 0x1f1   : > { %v4128_v22 = vadd.f32 %v1929_v28, %v1849_v40  ;;  %v1599_v26 = vmax.f32 %v1567_v38, 0.0  ;;  %v1472_v28 = vperm.slane %v1211_v36, 0 }
 0x1f3   : > { %3476 = vmatmul.msk.bf16.gmra.mxu1 %vm1305_vm2, %v3881_v15  ;;  %3526 = vmatmul.msk.bf16.gmra.mxu0 %vm1305_vm2, %v1776_v55  ;;  %v1631_v56 = vpack.c.bf16 %v1599_v26, %v1599_v26  ;;  %v1470_v55 = vperm.slane %v1210_v52, 0 }
 0x1f4   : > { %v1422_v44 = vpop.f32.mrf.mxu3 }
 0x1f5   : > { %v1757_v20 = vunpack.c.l.b16 %v1631_v56  ;;  %v1533_v11 = vadd.f32 %v1469_v47, %v1422_v44  ;;  %v1212_v47 = vrot.slane %v4144_v12, 2 }
 0x1f7   : > { %v1778_v51 = vpack.c.b16 %v1757_v20, %v1756_v62  ;;  %v1568_v54 = vadd.f32 %v3972_v49, %v1533_v11  ;;  %v4164_v62 = vpop.f32.mrf.mxu0 }
 0x1f8   : > { %v4135_v18 = vpop.f32.mrf.mxu1 }
 0x1f9   : > { %3462 = vmatmul.msk.bf16.gmra.mxu2 %vm1305_vm2, %v1778_v51  ;;  %v1600_v2 = vmax.f32 %v1568_v54, 0.0  ;;  %v1473_v54 = vperm.slane %v1212_v47, 0 }
 0x1fb   : > { %v1632_v34 = vpack.c.bf16 %v1600_v2, %v1600_v2 }
 0x1fc   : > { %v1424_v61 = vpop.f32.mrf.mxu3 }
 0x1fd   : > { %v1534_v13 = vadd.f32 %v1470_v55, %v1424_v61  ;;  %v1758_v16 = vunpack.c.l.b16 %v1632_v34  ;;  %v1679_v34 = vrot.slane %v4099_v39, 6 }
 0x1ff   : > { %v1569_v4 = vadd.f32 %v3972_v49, %v1534_v13 }
 0x200   : > { %v1854_v5 = vpop.f32.mrf.mxu1 }
 0x201   : > { %v4146_v7 = vadd.f32 %v1931_v3, %v1854_v5  ;;  %v1601_v8 = vmax.f32 %v1569_v4, 0.0  ;;  %v1213_v4 = vrot.slane %v4144_v12, 3 }
 0x203   : > { %3477 = vmatmul.msk.bf16.gmra.mxu1 %vm1305_vm2, %v3889_v43  ;;  %3527 = vmatmul.msk.bf16.gmra.mxu0 %vm1305_vm2, %v1777_v27  ;;  %v1633_v9 = vpack.c.bf16 %v1601_v8, %v1601_v8  ;;  %v1677_v27 = vrot.slane %v4099_v39, 4  ;;  %v4175_v8 = vpop.f32.mrf.mxu0 }
 0x204   : > { %v1427_v14 = vpop.f32.mrf.mxu3 }
 0x205   : > { %v1759_v17 = vunpack.c.l.b16 %v1633_v9  ;;  %v1535_v31 = vadd.f32 %v1471_v10, %v1427_v14  ;;  %v1933_v42 = vperm.slane %v1677_v27, 0 }
 0x207   : > { %v1779_v24 = vpack.c.b16 %v1759_v17, %v1758_v16  ;;  %v1570_v37 = vadd.f32 %v3972_v49, %v1535_v31  ;;  %v1935_v17 = vperm.slane %v1679_v34, 0 }
 0x208   : > { %v4154_v45 = vpop.f32.mrf.mxu1 }
 0x209   : > { %3463 = vmatmul.msk.bf16.gmra.mxu2 %vm1305_vm2, %v1779_v24  ;;  %v1602_v40 = vmax.f32 %v1570_v37, 0.0  ;;  %v1214_v37 = vrot.slane %v4144_v12, 4 }
 0x20b   : > { %v1634_v20 = vpack.c.bf16 %v1602_v40, %v1602_v40 }
 0x20c   : > { %v1429_v38 = vpop.f32.mrf.mxu3 }
 0x20d   : > { %v1536_v35 = vadd.f32 %v1472_v28, %v1429_v38  ;;  %v1760_v55 = vunpack.c.l.b16 %v1634_v20 }
 0x20f   : > { %v1571_v26 = vadd.f32 %v3972_v49, %v1536_v35  ;;  %v1475_v35 = vperm.slane %v1214_v37, 0 }
 0x210   : > { %v1859_v56 = vpop.f32.mrf.mxu1 }
 0x211   : > { %v4162_v44 = vadd.f32 %v1933_v42, %v1859_v56  ;;  %v1603_v11 = vmax.f32 %v1571_v26, 0.0 }
 0x213   : > { %3478 = vmatmul.msk.bf16.gmra.mxu1 %vm1305_vm2, %v3897_v63  ;;  %3528 = vmatmul.msk.bf16.gmra.mxu0 %vm1305_vm2, %v1778_v51  ;;  %v1635_v52 = vpack.c.bf16 %v1603_v11, %v1603_v11  ;;  %v1474_v51 = vperm.slane %v1213_v4, 0  ;;  %v4188_v11 = vpop.f32.mrf.mxu0 }
 0x214   : > { %v1432_v57 = vpop.f32.mrf.mxu3 }
 0x215   : > { %v1761_v61 = vunpack.c.l.b16 %v1635_v52  ;;  %v1537_v2 = vadd.f32 %v1473_v54, %v1432_v57  ;;  %v1215_v57 = vrot.slane %v4144_v12, 5 }
 0x217   : > { %v1780_v3 = vpack.c.b16 %v1761_v61, %v1760_v55  ;;  %v1572_v5 = vadd.f32 %v3972_v49, %v1537_v2 }
 0x218   : > { %v4169_v13 = vpop.f32.mrf.mxu1 }
 0x219   : > { %3464 = vmatmul.msk.bf16.gmra.mxu2 %vm1305_vm2, %v1780_v3  ;;  %v1604_v14 = vmax.f32 %v1572_v5, 0.0 }
 0x21b   : > { %v1636_v28 = vpack.c.bf16 %v1604_v14, %v1604_v14  ;;  %v1674_v14 = vrot.slane %v4099_v39, 1 }
 0x21c   : > { %v1434_v9 = vpop.f32.mrf.mxu3  ;;  %v4177_v10 = vpop.f32.mrf.mxu2 }
 0x21d   : > { %v1538_v16 = vadd.f32 %v1474_v51, %v1434_v9  ;;  %v1762_v56 = vunpack.c.l.b16 %v1636_v28  ;;  %v1216_v9 = vrot.slane %v4144_v12, 6 }
 0x21f   : > { %v1573_v31 = vadd.f32 %v3972_v49, %v1538_v16  ;;  %v4200_v16 = vpop.f32.mrf.mxu0 }
 0x220   : > { %v1864_v36 = vpop.f32.mrf.mxu1 }
 0x221   : > { %v4181_v27 = vadd.f32 %v1935_v17, %v1864_v36  ;;  %v1605_v38 = vmax.f32 %v1573_v31, 0.0  ;;  %v4206_v31 = vld [vmem:[%s4629_s11] ss:$0 sm:$0xff] }
 0x223   : > { %3479 = vmatmul.msk.bf16.gmra.mxu1 %vm1305_vm2, %v3913_v19  ;;  %3529 = vmatmul.msk.bf16.gmra.mxu0 %vm1305_vm2, %v1779_v24  ;;  %v1637_v40 = vpack.c.bf16 %v1605_v38, %v1605_v38  ;;  %v1476_v24 = vperm.slane %v1215_v57, 0  ;;  %v1477_v38 = vperm.slane %v1216_v9, 0 }
 0x224   : > { %v1437_v42 = vpop.f32.mrf.mxu3  ;;  %v4186_v26 = vpop.f32.mrf.mxu2 }
 0x225   : > { %v1763_v47 = vunpack.c.l.b16 %v1637_v40  ;;  %v1539_v20 = vadd.f32 %v1475_v35, %v1437_v42  ;;  %v1930_v40 = vperm.slane %v1674_v14, 0 }
 0x227   : > { %v1781_v54 = vpack.c.b16 %v1763_v47, %v1762_v56  ;;  %v1574_v55 = vadd.f32 %v3972_v49, %v1539_v20  ;;  %v1994_v57 = vadd.f32 %v1930_v40, %v4135_v18 }
 0x228   : > { %v4190_v52 = vpop.f32.mrf.mxu1 }
 0x229   : > { %3465 = vmatmul.msk.bf16.gmra.mxu2 %vm1305_vm2, %v1781_v54  ;;  %v1606_v4 = vmax.f32 %v1574_v55, 0.0 }
 0x22b   : > { %v1638_v36 = vpack.c.bf16 %v1606_v4, %v1606_v4 }
 0x22c   : > { %v1439_v61 = vpop.f32.mrf.mxu3  ;;  %v4195_v2 = vpop.f32.mrf.mxu2 }
 0x22d   : > { %v1540_v5 = vadd.f32 %v1476_v24, %v1439_v61  ;;  %v1217_v61 = vrot.slane %v4144_v12, 7 }
 0x22f   : > { %v1575_v34 = vadd.f32 %v3972_v49, %v1540_v5  ;;  %v1478_v9 = vperm.slane %v1217_v61, 0 }
 0x230   : > { %v2044_v51 = vpop.f32.mrf.mxu1 }
 0x231   : > { %v2124_v17 = vadd.f32 %v2044_v51, %v4128_v22  ;;  %v1607_v37 = vmax.f32 %v1575_v34, 0.0  ;;  %v1764_v22 = vunpack.c.l.b16 %v1638_v36  ;;  %v4218_v34 = vpop.f32.mrf.mxu0 }
 0x233   : > { %3480 = vmatmul.msk.bf16.gmra.mxu1 %vm1305_vm2, %v3928_v50  ;;  %3530 = vmatmul.msk.bf16.gmra.mxu0 %vm1305_vm2, %v1780_v3  ;;  %v1639_v28 = vpack.c.bf16 %v1607_v37, %v1607_v37  ;;  %v2159_v35 = vadd.f32 %v4206_v31, %v2124_v17 }
 0x234   : > { %v1442_v42 = vpop.f32.mrf.mxu3  ;;  %v4212_v56 = vpop.f32.mrf.mxu2 }
 0x235   : > { %v1765_v47 = vunpack.c.l.b16 %v1639_v28  ;;  %v1541_v20 = vadd.f32 %v1477_v38, %v1442_v42  ;;  %v2191_v4 = vmax.f32 %v2159_v35, 0.0  ;;  %v1676_v35 = vrot.slane %v4099_v39, 3 }
 0x237   : > { %v1782_v55 = vpack.c.b16 %v1765_v47, %v1764_v22  ;;  %v1576_v3 = vadd.f32 %v3972_v49, %v1541_v20  ;;  %v2223_v14 = vpack.c.bf16 %v2191_v4, %v2191_v4  ;;  %v1932_v4 = vperm.slane %v1676_v35, 0 }
 0x238   : > { %v2046_v24 = vpop.f32.mrf.mxu1 }
 0x239   : > { %v2125_v5 = vadd.f32 %v2046_v24, %v1994_v57  ;;  %3466 = vmatmul.msk.bf16.gmra.mxu2 %vm1305_vm2, %v1782_v55  ;;  %v1608_v18 = vmax.f32 %v1576_v3, 0.0  ;;  %v2349_v42 = vunpack.c.l.b16 %v2223_v14 }
 0x23b   : > { %v2160_v51 = vadd.f32 %v4206_v31, %v2125_v5  ;;  %v1640_v20 = vpack.c.bf16 %v1608_v18, %v1608_v18  ;;  %v4229_v5 = vpop.f32.mrf.mxu0 }
 0x23c   : > { %v1444_v36 = vpop.f32.mrf.mxu3  ;;  %v4221_v37 = vpop.f32.mrf.mxu2 }
 0x23d   : > { %v2192_v17 = vmax.f32 %v2160_v51, 0.0  ;;  %v1542_v28 = vadd.f32 %v1478_v9, %v1444_v36  ;;  %v1766_v51 = vunpack.c.l.b16 %v1640_v20  ;;  %v1996_v9 = vadd.f32 %v1932_v4, %v4154_v45 }
 0x23f   : > { %v2224_v38 = vpack.c.bf16 %v2192_v17, %v2192_v17  ;;  %v1577_v12 = vadd.f32 %v3972_v49, %v1542_v28 }
 0x240   : > { %v2049_v40 = vpop.f32.mrf.mxu1 }
 0x241   : > { %v2350_v22 = vunpack.c.l.b16 %v2224_v38  ;;  %v2126_v47 = vadd.f32 %v2049_v40, %v4146_v7  ;;  %v1609_v57 = vmax.f32 %v1577_v12, 0.0 }
 0x243   : > { %v2381_v24 = vpack.c.b16 %v2350_v22, %v2349_v42  ;;  %3481 = vmatmul.msk.bf16.gmra.mxu1 %vm1305_vm2, %v3944_v6  ;;  %3531 = vmatmul.msk.bf16.gmra.mxu0 %vm1305_vm2, %v1781_v54  ;;  %v1641_v61 = vpack.c.bf16 %v1609_v57, %v1609_v57  ;;  %v2161_v49 = vadd.f32 %v4206_v31, %v2126_v47  ;;  %v4240_v40 = vpop.f32.mrf.mxu0  ;;  %v1678_v22 = vrot.slane %v4099_v39, 5 }
 0x244   : > { %v4232_v3 = vpop.f32.mrf.mxu2 }
 0x245   : > { %3498 = vmatmul.msk.bf16.vlgmr.msrb.gmra.mxu3 %vm1305_vm2, %v2381_v24  ;;  %v1767_v7 = vunpack.c.l.b16 %v1641_v61  ;;  %v2193_v36 = vmax.f32 %v2161_v49, 0.0  ;;  %v1934_v24 = vperm.slane %v1678_v22, 0 }
 0x247   : > { %v1783_v14 = vpack.c.b16 %v1767_v7, %v1766_v51  ;;  %v2225_v28 = vpack.c.bf16 %v2193_v36, %v2193_v36  ;;  %v1998_v49 = vadd.f32 %v1934_v24, %v4169_v13  ;;  %v1688_v13 = vrot.slane %v4113_v41, 1 }
 0x248   : > { %v2051_v17 = vpop.f32.mrf.mxu1 }
 0x249   : > { %v2127_v18 = vadd.f32 %v2051_v17, %v1996_v9  ;;  %3467 = vmatmul.msk.bf16.gmra.mxu2 %vm1305_vm2, %v1783_v14  ;;  %v2351_v47 = vunpack.c.l.b16 %v2225_v28 }
 0x24b   : > { %v2162_v54 = vadd.f32 %v4206_v31, %v2127_v18  ;;  %v4252_v7 = vpop.f32.mrf.mxu0 }
 0x24c   : > { %v4238_v12 = vpop.f32.mrf.mxu2 }
 0x24d   : > { %v2194_v38 = vmax.f32 %v2162_v54, 0.0 }
 0x24f   : > { %v2226_v35 = vpack.c.bf16 %v2194_v38, %v2194_v38 }
 0x250   : > { %v2054_v42 = vpop.f32.mrf.mxu1 }
 0x251   : > { %v2352_v45 = vunpack.c.l.b16 %v2226_v35  ;;  %v2128_v20 = vadd.f32 %v2054_v42, %v4162_v44  ;;  %v1680_v42 = vrot.slane %v4099_v39, 7 }
 0x253   : > { %v2382_v57 = vpack.c.b16 %v2352_v45, %v2351_v47  ;;  %3482 = vmatmul.msk.bf16.gmra.mxu1 %vm1305_vm2, %v3976_v53  ;;  %3532 = vmatmul.msk.bf16.gmra.mxu0 %vm1305_vm2, %v1782_v55  ;;  %v2163_v61 = vadd.f32 %v4206_v31, %v2128_v20  ;;  %v1945_v55 = vperm.slane %v4113_v41, 0  ;;  %v1936_v24 = vperm.slane %v1680_v42, 0 }
 0x254   : > { %v4248_v4 = vpop.f32.mrf.mxu2 }
 0x255   : > { %3499 = vmatmul.msk.bf16.gmra.mxu3 %vm1305_vm2, %v2382_v57  ;;  %v2195_v9 = vmax.f32 %v2163_v61, 0.0  ;;  %v1946_v57 = vperm.slane %v1688_v13, 0 }
 0x257   : > { %v2227_v36 = vpack.c.bf16 %v2195_v9, %v2195_v9  ;;  %v1689_v9 = vrot.slane %v4113_v41, 2 }
 0x258   : > { %v2056_v51 = vpop.f32.mrf.mxu1 }
 0x259   : > { %v2129_v44 = vadd.f32 %v2056_v51, %v1998_v49  ;;  %3538 = vmatmul.msk.bf16.vlgmr.msra.gmra.mxu2 %vm1305_vm2, %v3851_v29  ;;  %v2353_v22 = vunpack.c.l.b16 %v2227_v36  ;;  %v4263_v29 = vpop.f32.mrf.mxu0  ;;  %v2000_v51 = vadd.f32 %v1936_v24, %v4190_v52  ;;  %v1937_v36 = vperm.slane %v4105_v48, 0 }
 0x25b   : > { %v2164_v17 = vadd.f32 %v4206_v31, %v2129_v44  ;;  %v2001_v52 = vadd.f32 %v1937_v36, %v4177_v10 }
 0x25c   : > { %v1889_v54 = vpop.f32.mrf.mxu2 }
 0x25d   : > { %v2196_v18 = vmax.f32 %v2164_v17, 0.0  ;;  %v4258_v28 = vadd.f32 %v1945_v55, %v1889_v54  ;;  %v1947_v55 = vperm.slane %v1689_v9, 0 }
 0x25f   : > { %v2228_v38 = vpack.c.bf16 %v2196_v18, %v2196_v18 }
 0x260   : > { %v2059_v35 = vpop.f32.mrf.mxu1 }
 0x261   : > { %v2354_v47 = vunpack.c.l.b16 %v2228_v38  ;;  %v2130_v45 = vadd.f32 %v2059_v35, %v4181_v27 }
 0x263   : > { %v2383_v20 = vpack.c.b16 %v2354_v47, %v2353_v22  ;;  %3483 = vmatmul.msk.bf16.gmra.mxu1 %vm1305_vm2, %v3999_v1  ;;  %3533 = vmatmul.msk.bf16.gmra.mxu0 %vm1305_vm2, %v1783_v14  ;;  %v2165_v61 = vadd.f32 %v4206_v31, %v2130_v45  ;;  %v1690_v22 = vrot.slane %v4113_v41, 3  ;;  %v1681_v47 = vrot.slane %v4105_v48, 1 }
 0x264   : > { %v1891_v49 = vpop.f32.mrf.mxu2 }
 0x265   : > { %3500 = vmatmul.msk.bf16.gmra.mxu3 %vm1305_vm2, %v2383_v20  ;;  %v4270_v39 = vadd.f32 %v1946_v57, %v1891_v49  ;;  %v2197_v44 = vmax.f32 %v2165_v61, 0.0  ;;  %v1948_v24 = vperm.slane %v1690_v22, 0  ;;  %v1938_v61 = vperm.slane %v1681_v47, 0 }
 0x267   : > { %v2229_v18 = vpack.c.bf16 %v2197_v44, %v2197_v44  ;;  %v1691_v44 = vrot.slane %v4113_v41, 4 }
 0x268   : > { %v2061_v27 = vpop.f32.mrf.mxu1 }
 0x269   : > { %v2131_v17 = vadd.f32 %v2061_v27, %v2000_v51  ;;  %3539 = vmatmul.msk.bf16.gmra.mxu2 %vm1305_vm2, %v3868_v58  ;;  %v2355_v45 = vunpack.c.l.b16 %v2229_v18  ;;  %v2002_v27 = vadd.f32 %v1938_v61, %v4186_v26  ;;  %v1949_v18 = vperm.slane %v1691_v44, 0 }
 0x26b   : > { %v2166_v14 = vadd.f32 %v4206_v31, %v2131_v17  ;;  %v1682_v17 = vrot.slane %v4105_v48, 2 }
 0x26c   : > { %v1894_v38 = vpop.f32.mrf.mxu2 }
 0x26d   : > { %v2198_v54 = vmax.f32 %v2166_v14, 0.0  ;;  %v4278_v35 = vadd.f32 %v1947_v55, %v1894_v38 }
 0x26f   : > { %v2230_v13 = vpack.c.bf16 %v2198_v54, %v2198_v54  ;;  %v1939_v54 = vperm.slane %v1682_v17, 0  ;;  %v1693_v17 = vrot.slane %v4113_v41, 6 }
 0x270   : > { %v2064_v42 = vpop.f32.mrf.mxu1 }
 0x271   : > { %v2356_v58 = vunpack.c.l.b16 %v2230_v13  ;;  %v2132_v20 = vadd.f32 %v2064_v42, %v2001_v52  ;;  %v2003_v26 = vadd.f32 %v1939_v54, %v4195_v2  ;;  %v1951_v54 = vperm.slane %v1693_v17, 0 }
 0x273   : > { %v2384_v57 = vpack.c.b16 %v2356_v58, %v2355_v45  ;;  %3484 = vmatmul.msk.bf16.gmra.mxu1 %vm1305_vm2, %v4024_v23  ;;  %v2167_v49 = vadd.f32 %v4206_v31, %v2132_v20  ;;  %v1692_v45 = vrot.slane %v4113_v41, 5  ;;  %v1683_v58 = vrot.slane %v4105_v48, 3 }
 0x274   : > { %v1896_v51 = vpop.f32.mrf.mxu2 }
 0x275   : > { %3501 = vmatmul.msk.bf16.gmra.mxu3 %vm1305_vm2, %v2384_v57  ;;  %v4287_v10 = vadd.f32 %v1948_v24, %v1896_v51  ;;  %v2199_v14 = vmax.f32 %v2167_v49, 0.0  ;;  %v1950_v61 = vperm.slane %v1692_v45, 0  ;;  %v1940_v49 = vperm.slane %v1683_v58, 0 }
 0x276   : > { %v1694_v58 = vrot.slane %v4113_v41, 7 }
 0x277   : > { %v2231_v38 = vpack.c.bf16 %v2199_v14, %v2199_v14  ;;  %v1684_v14 = vrot.slane %v4105_v48, 4 }
 0x278   : > { %v2066_v9 = vpop.f32.mrf.mxu1 }
 0x279   : > { %v2133_v55 = vadd.f32 %v2066_v9, %v2002_v27  ;;  %3540 = vmatmul.msk.bf16.gmra.mxu2 %vm1305_vm2, %v3855_v33  ;;  %v2357_v20 = vunpack.c.l.b16 %v2231_v38  ;;  %v2004_v9 = vadd.f32 %v1940_v49, %v4212_v56  ;;  %v1941_v38 = vperm.slane %v1684_v14, 0 }
 0x27b   : > { %v2168_v36 = vadd.f32 %v4206_v31, %v2133_v55  ;;  %v2005_v56 = vadd.f32 %v1941_v38, %v4221_v37 }
 0x27c   : > { %v1899_v13 = vpop.f32.mrf.mxu2 }
 0x27d   : > { %v2200_v52 = vmax.f32 %v2168_v36, 0.0  ;;  %v4295_v42 = vadd.f32 %v1949_v18, %v1899_v13 }
 0x27f   : > { %v2232_v22 = vpack.c.bf16 %v2200_v52, %v2200_v52 }
 0x280   : > { %v2069_v47 = vpop.f32.mrf.mxu1 }
 0x281   : > { %v2358_v57 = vunpack.c.l.b16 %v2232_v22  ;;  %v2134_v33 = vadd.f32 %v2069_v47, %v2003_v26 }
 0x283   : > { %v2385_v24 = vpack.c.b16 %v2358_v57, %v2357_v20  ;;  %3485 = vmatmul.msk.bf16.gmra.mxu1 %vm1305_vm2, %v4050_v25  ;;  %v2169_v51 = vadd.f32 %v4206_v31, %v2134_v33  ;;  %v1685_v20 = vrot.slane %v4105_v48, 5 }
 0x284   : > { %v1901_v27 = vpop.f32.mrf.mxu2 }
 0x285   : > { %3502 = vmatmul.msk.bf16.gmra.mxu3 %vm1305_vm2, %v2385_v24  ;;  %v4304_v2 = vadd.f32 %v1950_v61, %v1901_v27  ;;  %v2201_v55 = vmax.f32 %v2169_v51, 0.0  ;;  %v1952_v61 = vperm.slane %v1694_v58, 0  ;;  %v1942_v49 = vperm.slane %v1685_v20, 0 }
 0x287   : > { %v2233_v52 = vpack.c.bf16 %v2201_v55, %v2201_v55  ;;  %v2006_v41 = vadd.f32 %v1942_v49, %v4232_v3  ;;  %v1687_v3 = vrot.slane %v4105_v48, 7 }
 0x288   : > { %v2071_v44 = vpop.f32.mrf.mxu1 }
 0x289   : > { %v2135_v36 = vadd.f32 %v2071_v44, %v2004_v9  ;;  %3541 = vmatmul.msk.bf16.gmra.mxu2 %vm1305_vm2, %v3870_v60  ;;  %v2359_v57 = vunpack.c.l.b16 %v2233_v52  ;;  %v1686_v44 = vrot.slane %v4105_v48, 6 }
 0x28b   : > { %v2170_v18 = vadd.f32 %v4206_v31, %v2135_v36  ;;  %v1943_v36 = vperm.slane %v1686_v44, 0 }
 0x28c   : > { %v1904_v26 = vpop.f32.mrf.mxu2 }
 0x28d   : > { %v2202_v13 = vmax.f32 %v2170_v18, 0.0  ;;  %v4312_v22 = vadd.f32 %v1951_v54, %v1904_v26  ;;  %v2007_v52 = vadd.f32 %v1943_v36, %v4238_v12 }
 0x28f   : > { %v2234_v47 = vpack.c.bf16 %v2202_v13, %v2202_v13 }
 0x290   : > { %v2074_v45 = vpop.f32.mrf.mxu1 }
 0x291   : > { %v2360_v33 = vunpack.c.l.b16 %v2234_v47  ;;  %v2136_v60 = vadd.f32 %v2074_v45, %v2005_v56 }
 0x293   : > { %v2386_v24 = vpack.c.b16 %v2360_v33, %v2359_v57  ;;  %3486 = vmatmul.msk.bf16.gmra.mxu1 %vm1305_vm2, %v4066_v30  ;;  %v2171_v51 = vadd.f32 %v4206_v31, %v2136_v60 }
 0x294   : > { %v1906_v27 = vpop.f32.mrf.mxu2 }
 0x295   : > { %3503 = vmatmul.msk.bf16.gmra.mxu3 %vm1305_vm2, %v2386_v24  ;;  %v4321_v37 = vadd.f32 %v1952_v61, %v1906_v27  ;;  %v2203_v17 = vmax.f32 %v2171_v51, 0.0 }
 0x297   : > { %v2235_v18 = vpack.c.bf16 %v2203_v17, %v2203_v17 }
 0x298   : > { %v2076_v9 = vpop.f32.mrf.mxu1 }
 0x299   : > { %v2137_v14 = vadd.f32 %v2076_v9, %v2006_v41  ;;  %3542 = vmatmul.msk.bf16.gmra.mxu2 %vm1305_vm2, %v3881_v15  ;;  %v2361_v56 = vunpack.c.l.b16 %v2235_v18  ;;  %v1944_v15 = vperm.slane %v1687_v3, 0 }
 0x29b   : > { %v2172_v55 = vadd.f32 %v4206_v31, %v2137_v14  ;;  %v2008_v12 = vadd.f32 %v1944_v15, %v4248_v4 }
 0x29c   : > { %v4328_v38 = vpop.f32.mrf.mxu2 }
 0x29d   : > { %v2204_v54 = vmax.f32 %v2172_v55, 0.0 }
 0x29f   : > { %v2236_v13 = vpack.c.bf16 %v2204_v54, %v2204_v54 }
 0x2a0   : > { %v2079_v26 = vpop.f32.mrf.mxu1 }
 0x2a1   : > { %v2362_v47 = vunpack.c.l.b16 %v2236_v13  ;;  %v2138_v45 = vadd.f32 %v2079_v26, %v2007_v52 }
 0x2a3   : > { %v2387_v58 = vpack.c.b16 %v2362_v47, %v2361_v56  ;;  %3487 = vmatmul.msk.bf16.gmra.mxu1 %vm1305_vm2, %v4080_v59  ;;  %v2173_v20 = vadd.f32 %v4206_v31, %v2138_v45 }
 0x2a4   : > { %v4335_v57 = vpop.f32.mrf.mxu2 }
 0x2a5   : > { %3504 = vmatmul.msk.bf16.gmra.mxu3 %vm1305_vm2, %v2387_v58  ;;  %v2205_v60 = vmax.f32 %v2173_v20, 0.0 }
 0x2a7   : > { %v2237_v61 = vpack.c.bf16 %v2205_v60, %v2205_v60 }
 0x2a8   : > { %v2081_v33 = vpop.f32.mrf.mxu1 }
 0x2a9   : > { %v2139_v24 = vadd.f32 %v2081_v33, %v2008_v12  ;;  %3543 = vmatmul.msk.bf16.gmra.mxu2 %vm1305_vm2, %v3889_v43  ;;  %v2363_v9 = vunpack.c.l.b16 %v2237_v61 }
 0x2ab   : > { %v2174_v48 = vadd.f32 %v4206_v31, %v2139_v24 }
 0x2ac   : > { %v4342_v51 = vpop.f32.mrf.mxu2 }
 0x2ad   : > { %v2206_v49 = vmax.f32 %v2174_v48, 0.0 }
 0x2af   : > { %v2238_v27 = vpack.c.bf16 %v2206_v49, %v2206_v49 }
 0x2b0   : > { %v2084_v41 = vpop.f32.mrf.mxu1 }
 0x2b1   : > { %v2364_v44 = vunpack.c.l.b16 %v2238_v27  ;;  %v2140_v17 = vadd.f32 %v2084_v41, %v4258_v28 }
 0x2b3   : > { %v2388_v14 = vpack.c.b16 %v2364_v44, %v2363_v9  ;;  %v2175_v4 = vadd.f32 %v4206_v31, %v2140_v17 }
 0x2b4   : > { %v4346_v55 = vpop.f32.mrf.mxu2 }
 0x2b5   : > { %3505 = vmatmul.msk.bf16.gmra.mxu3 %vm1305_vm2, %v2388_v14  ;;  %v2207_v36 = vmax.f32 %v2175_v4, 0.0 }
 0x2b7   : > { %v2239_v52 = vpack.c.bf16 %v2207_v36, %v2207_v36 }
 0x2b8   : > { %v2086_v43 = vpop.f32.mrf.mxu1 }
 0x2b9   : > { %v2141_v18 = vadd.f32 %v2086_v43, %v4270_v39  ;;  %3544 = vmatmul.msk.bf16.gmra.mxu2 %vm1305_vm2, %v3897_v63  ;;  %v2365_v56 = vunpack.c.l.b16 %v2239_v52 }
 0x2bb   : > { %v2176_v54 = vadd.f32 %v4206_v31, %v2141_v18 }
 0x2bc   : > { %v4353_v26 = vpop.f32.mrf.mxu2 }
 0x2bd   : > { %v2208_v13 = vmax.f32 %v2176_v54, 0.0 }
 0x2bf   : > { %v2240_v28 = vpack.c.bf16 %v2208_v13, %v2208_v13 }
 0x2c0   : > { %v2089_v3 = vpop.f32.mrf.mxu1 }
 0x2c1   : > { %v2366_v47 = vunpack.c.l.b16 %v2240_v28  ;;  %v2142_v45 = vadd.f32 %v2089_v3, %v4278_v35 }
 0x2c3   : > { %v2389_v58 = vpack.c.b16 %v2366_v47, %v2365_v56  ;;  %v2177_v15 = vadd.f32 %v4206_v31, %v2142_v45 }
 0x2c4   : > { %v4357_v20 = vpop.f32.mrf.mxu2 }
 0x2c5   : > { %3506 = vmatmul.msk.bf16.gmra.mxu3 %vm1305_vm2, %v2389_v58  ;;  %v2209_v12 = vmax.f32 %v2177_v15, 0.0 }
 0x2c7   : > { %v2241_v24 = vpack.c.bf16 %v2209_v12, %v2209_v12 }
 0x2c8   : > { %v2091_v63 = vpop.f32.mrf.mxu1  ;;  %v4360_v39 = vpop.f32.mrf.mxu3 }
 0x2c9   : > { %v2143_v33 = vadd.f32 %v2091_v63, %v4287_v10  ;;  %3545 = vmatmul.msk.bf16.gmra.mxu2 %vm1305_vm2, %v3913_v19  ;;  %v2367_v41 = vunpack.c.l.b16 %v2241_v24  ;;  %v4388_v24 = vpop.f32.mrf.mxu0 }
 0x2cb   : > { %v2178_v60 = vadd.f32 %v4206_v31, %v2143_v33 }
 0x2cc   : > { %v4366_v48 = vpop.f32.mrf.mxu2 }
 0x2cd   : > { %v2210_v35 = vmax.f32 %v2178_v60, 0.0 }
 0x2cf   : > { %v2242_v61 = vpack.c.bf16 %v2210_v35, %v2210_v35 }
 0x2d0   : > { %v2094_v49 = vpop.f32.mrf.mxu1  ;;  %v4368_v27 = vpop.f32.mrf.mxu3 }
 0x2d1   : > { %v2368_v9 = vunpack.c.l.b16 %v2242_v61  ;;  %v2144_v44 = vadd.f32 %v2094_v49, %v4295_v42 }
 0x2d3   : > { %v2390_v17 = vpack.c.b16 %v2368_v9, %v2367_v41  ;;  %v2179_v10 = vadd.f32 %v4206_v31, %v2144_v44 }
 0x2d4   : > { %v4372_v14 = vpop.f32.mrf.mxu2 }
 0x2d5   : > { %3507 = vmatmul.msk.bf16.gmra.mxu3 %vm1305_vm2, %v2390_v17  ;;  %v2211_v43 = vmax.f32 %v2179_v10, 0.0  ;;  %v1695_v10 = vrot.slane %v4120_v21, 1 }
 0x2d7   : > { %v2243_v54 = vpack.c.bf16 %v2211_v43, %v2211_v43 }
 0x2d8   : > { %v2096_v19 = vpop.f32.mrf.mxu1  ;;  %v2467_v4 = vpop.f32.mrf.mxu3 }
 0x2d9   : > { %v2145_v36 = vadd.f32 %v2096_v19, %v4304_v2  ;;  %3546 = vmatmul.msk.bf16.gmra.mxu2 %vm1305_vm2, %v3928_v50  ;;  %v2369_v56 = vunpack.c.l.b16 %v2243_v54  ;;  %v1954_v54 = vperm.slane %v1695_v10, 0 }
 0x2db   : > { %v2180_v18 = vadd.f32 %v4206_v31, %v2145_v36 }
 0x2dc   : > { %v4379_v42 = vpop.f32.mrf.mxu2 }
 0x2dd   : > { %v2212_v52 = vmax.f32 %v2180_v18, 0.0  ;;  %v2288_v18 = vrot.slane %v4133_v46, 2 }
 0x2df   : > { %v2244_v13 = vpack.c.bf16 %v2212_v52, %v2212_v52 }
 0x2e0   : > { %v2099_v28 = vpop.f32.mrf.mxu1  ;;  %v2469_v3 = vpop.f32.mrf.mxu3 }
 0x2e1   : > { %v2370_v47 = vunpack.c.l.b16 %v2244_v13  ;;  %v2146_v45 = vadd.f32 %v2099_v28, %v4312_v22  ;;  %v1953_v22 = vperm.slane %v4120_v21, 0  ;;  %v4398_v28 = vpop.f32.mrf.mxu0 }
 0x2e3   : > { %v2391_v58 = vpack.c.b16 %v2370_v47, %v2369_v56  ;;  %v2181_v15 = vadd.f32 %v4206_v31, %v2146_v45  ;;  %v2017_v41 = vadd.f32 %v1953_v22, %v4328_v38  ;;  %v2289_v38 = vrot.slane %v4133_v46, 3 }
 0x2e4   : > { %v2790_v2 = vpop.f32.mrf.mxu2  ;;  %v2018_v56 = vadd.f32 %v1954_v54, %v4335_v57  ;;  %v2290_v45 = vrot.slane %v4133_v46, 4  ;;  %v2291_v57 = vrot.slane %v4133_v46, 5 }
 0x2e5   : > { %3508 = vmatmul.msk.bf16.gmra.mxu3 %vm1305_vm2, %v2391_v58  ;;  %v2213_v12 = vmax.f32 %v2181_v15, 0.0  ;;  %v1696_v58 = vrot.slane %v4120_v21, 2  ;;  %v2542_v15 = vperm.slane %v4133_v46, 0 }
 0x2e6   : > { %v2547_v54 = vperm.slane %v2291_v57, 0 }
 0x2e7   : > { %v2245_v35 = vpack.c.bf16 %v2213_v12, %v2213_v12 }
 0x2e8   : > { %v2101_v50 = vpop.f32.mrf.mxu1  ;;  %v2472_v63 = vpop.f32.mrf.mxu3 }
 0x2e9   : > { %v2147_v33 = vadd.f32 %v2101_v50, %v4321_v37  ;;  %3547 = vmatmul.msk.bf16.gmra.mxu2 %vm1305_vm2, %v3944_v6  ;;  %v2371_v37 = vunpack.c.l.b16 %v2245_v35  ;;  %v2287_v6 = vrot.slane %v4133_v46, 1  ;;  %v2544_v50 = vperm.slane %v2288_v18, 0 }
 0x2eb   : > { %v2182_v60 = vadd.f32 %v4206_v31, %v2147_v33  ;;  %v2543_v47 = vperm.slane %v2287_v6, 0 }
 0x2ec   : > { %v2793_v49 = vpop.f32.mrf.mxu2 }
 0x2ed   : > { %v2214_v61 = vmax.f32 %v2182_v60, 0.0  ;;  %v2607_v60 = vadd.f32 %v2543_v47, %v4368_v27 }
 0x2ef   : > { %v2246_v9 = vpack.c.bf16 %v2214_v61, %v2214_v61  ;;  %v2606_v61 = vadd.f32 %v2542_v15, %v4360_v39  ;;  %v4417_v15 = vpop.f32.mrf.mxu0 }
 0x2f0   : > { %v2104_v44 = vpop.f32.mrf.mxu1  ;;  %v2474_v17 = vpop.f32.mrf.mxu3 }
 0x2f1   : > { %v2372_v19 = vunpack.c.l.b16 %v2246_v9  ;;  %v2148_v43 = vadd.f32 %v2104_v44, %v2017_v41  ;;  %v2608_v41 = vadd.f32 %v2544_v50, %v2467_v4  ;;  %v2545_v9 = vperm.slane %v2289_v38, 0 }
 0x2f2   : > { %v2546_v44 = vperm.slane %v2290_v45, 0  ;;  %v2737_v39 = vadd.f32 %v4175_v8, %v2606_v61  ;;  %v2611_v45 = vadd.f32 %v2547_v54, %v2474_v17  ;;  %v4422_v8 = vld [vmem:[%s4634_s16] ss:$0 sm:$0xff] }
 0x2f3   : > { %v2392_v36 = vpack.c.b16 %v2372_v19, %v2371_v37  ;;  %v2183_v52 = vadd.f32 %v4206_v31, %v2148_v43  ;;  %v1955_v37 = vperm.slane %v1696_v58, 0  ;;  %v2609_v19 = vadd.f32 %v2545_v9, %v2469_v3 }
 0x2f4   : > { %v2795_v13 = vpop.f32.mrf.mxu2  ;;  %v2738_v43 = vadd.f32 %v4188_v11, %v2607_v60  ;;  %v2610_v6 = vadd.f32 %v2546_v44, %v2472_v63  ;;  %v2739_v4 = vadd.f32 %v4200_v16, %v2608_v41  ;;  %v2868_v47 = vadd.f32 %v4379_v42, %v2737_v39 }
 0x2f5   : > { %3509 = vmatmul.msk.bf16.gmra.mxu3 %vm1305_vm2, %v2392_v36  ;;  %v2215_v22 = vmax.f32 %v2183_v52, 0.0  ;;  %v2019_v52 = vadd.f32 %v1955_v37, %v4342_v51  ;;  %v2740_v11 = vadd.f32 %v4218_v34, %v2609_v19  ;;  %v2292_v42 = vrot.slane %v4133_v46, 6 }
 0x2f6   : > { %v2869_v38 = vadd.f32 %v2790_v2, %v2738_v43  ;;  %v2870_v3 = vadd.f32 %v2793_v49, %v2739_v4  ;;  %v2741_v2 = vadd.f32 %v4229_v5, %v2610_v6  ;;  %v2903_v61 = vadd.f32 %v4422_v8, %v2868_v47 }
 0x2f7   : > { %v2247_v27 = vpack.c.bf16 %v2215_v22, %v2215_v22  ;;  %v2742_v22 = vadd.f32 %v4240_v40, %v2611_v45 }
 0x2f8   : > { %v2106_v12 = vpop.f32.mrf.mxu1  ;;  %v2477_v33 = vpop.f32.mrf.mxu3  ;;  %v2904_v49 = vadd.f32 %v4422_v8, %v2869_v38  ;;  %v2905_v60 = vadd.f32 %v4422_v8, %v2870_v3 }
 0x2f9   : > { %v2149_v35 = vadd.f32 %v2106_v12, %v2018_v56  ;;  %3548 = vmatmul.msk.bf16.gmra.mxu2 %vm1305_vm2, %v3976_v53  ;;  %v1697_v53 = vrot.slane %v4120_v21, 3  ;;  %v2373_v16 = vunpack.c.l.b16 %v2247_v27  ;;  %v2871_v12 = vadd.f32 %v2795_v13, %v2740_v11 }
 0x2fa   : > { %v2548_v13 = vperm.slane %v2292_v42, 0  ;;  %v2947_v19 = vrot.slane %v2905_v60, 4 }
 0x2fb   : > { %v2184_v10 = vadd.f32 %v4206_v31, %v2149_v35  ;;  %v1956_v35 = vperm.slane %v1697_v53, 0  ;;  %v2906_v5 = vadd.f32 %v4422_v8, %v2871_v12 }
 0x2fc   : > { %v2798_v18 = vpop.f32.mrf.mxu2  ;;  %v2612_v43 = vadd.f32 %v2548_v13, %v2477_v33 }
 0x2fd   : > { %v2216_v36 = vmax.f32 %v2184_v10, 0.0  ;;  %v2872_v17 = vadd.f32 %v2798_v18, %v2741_v2  ;;  %v2020_v44 = vadd.f32 %v1956_v35, %v4346_v55  ;;  %v2941_v10 = vrot.slane %v2904_v49, 4  ;;  %v4442_v55 = vpop.f32.mrf.mxu0 }
 0x2fe   : > { %v2935_v18 = vrot.slane %v2903_v61, 4  ;;  %v2953_v54 = vrot.slane %v2906_v5, 4  ;;  %v2743_v3 = vadd.f32 %v4252_v7, %v2612_v43 }
 0x2ff   : > { %v2248_v56 = vpack.c.bf16 %v2216_v36, %v2216_v36  ;;  %v2907_v37 = vadd.f32 %v4422_v8, %v2872_v17  ;;  %v1698_v36 = vrot.slane %v4120_v21, 4  ;;  %v2942_v53 = vmax.f32 %v2904_v49, %v2941_v10 }
 0x300   : > { %v2109_v63 = vpop.f32.mrf.mxu1  ;;  %v2479_v58 = vpop.f32.mrf.mxu3  ;;  %v2936_v11 = vmax.f32 %v2903_v61, %v2935_v18  ;;  %v2954_v2 = vmax.f32 %v2906_v5, %v2953_v54  ;;  %v1700_v54 = vrot.slane %v4120_v21, 6 }
 0x301   : > { %v2374_v51 = vunpack.c.l.b16 %v2248_v56  ;;  %v2150_v50 = vadd.f32 %v2109_v63, %v2019_v52  ;;  %v2293_v52 = vrot.slane %v4133_v46, 7  ;;  %v2959_v33 = vrot.slane %v2907_v37, 4 }
 0x302   : > { %v2948_v56 = vmax.f32 %v2905_v60, %v2947_v19  ;;  %v1957_v45 = vperm.slane %v1698_v36, 0  ;;  %v1699_v46 = vrot.slane %v4120_v21, 5  ;;  %v2943_v42 = vrot.slane %v2942_v53, 2 }
 0x303   : > { %v2393_v34 = vpack.c.b16 %v2374_v51, %v2373_v16  ;;  %v2185_v41 = vadd.f32 %v4206_v31, %v2150_v50  ;;  %v2549_v50 = vperm.slane %v2293_v52, 0  ;;  %v2960_v49 = vmax.f32 %v2907_v37, %v2959_v33 }
 0x304   : > { %v2800_v9 = vpop.f32.mrf.mxu2  ;;  %v2021_v12 = vadd.f32 %v1957_v45, %v4353_v26  ;;  %v2949_v17 = vrot.slane %v2948_v56, 2  ;;  %v2955_v5 = vrot.slane %v2954_v2, 2  ;;  %v2944_v10 = vmax.f32 %v2942_v53, %v2943_v42 }
 0x305   : > { %3510 = vmatmul.msk.bf16.gmra.mxu3 %vm1305_vm2, %v2393_v34  ;;  %v2873_v57 = vadd.f32 %v2800_v9, %v2742_v22  ;;  %v2217_v39 = vmax.f32 %v2185_v41, 0.0  ;;  %v2613_v60 = vadd.f32 %v2549_v50, %v2479_v58  ;;  %v2937_v41 = vrot.slane %v2936_v11, 2 }
 0x306   : > { %v2961_v19 = vrot.slane %v2960_v49, 2  ;;  %v2950_v43 = vmax.f32 %v2948_v56, %v2949_v17  ;;  %v1958_v36 = vperm.slane %v1699_v46, 0  ;;  %v2956_v52 = vmax.f32 %v2954_v2, %v2955_v5 }
 0x307   : > { %v2908_v40 = vadd.f32 %v4422_v8, %v2873_v57  ;;  %v2249_v63 = vpack.c.bf16 %v2217_v39, %v2217_v39  ;;  %v2744_v58 = vadd.f32 %v4263_v29, %v2613_v60  ;;  %v2938_v18 = vmax.f32 %v2936_v11, %v2937_v41 }
 0x308   : > { %v2111_v6 = vpop.f32.mrf.mxu1  ;;  %v4436_v27 = vpop.f32.mrf.mxu3  ;;  %v2945_v56 = vrot.slane %v2944_v10, 1  ;;  %v1701_v2 = vrot.slane %v4120_v21, 7 }
 0x309   : > { %v2151_v4 = vadd.f32 %v2111_v6, %v2020_v44  ;;  %3549 = vmatmul.msk.bf16.gmra.mxu2 %vm1305_vm2, %v3999_v1  ;;  %v2965_v47 = vrot.slane %v2908_v40, 4  ;;  %v2375_v9 = vunpack.c.l.b16 %v2249_v63 }
 0x30b   : > { %v2186_v38 = vadd.f32 %v4206_v31, %v2151_v4  ;;  %v2966_v22 = vmax.f32 %v2908_v40, %v2965_v47  ;;  %v4452_v40 = vpop.f32.mrf.mxu0  ;;  %v2962_v47 = vmax.f32 %v2960_v49, %v2961_v19 }
 0x30c   : > { %v2803_v51 = vpop.f32.mrf.mxu2 }
 0x30d   : > { %v2218_v16 = vmax.f32 %v2186_v38, 0.0  ;;  %v2874_v1 = vadd.f32 %v2803_v51, %v2743_v3  ;;  %v2967_v37 = vrot.slane %v2966_v22, 2  ;;  %v2022_v38 = vadd.f32 %v1958_v36, %v4357_v20 }
 0x30e   : > { %v2951_v3 = vrot.slane %v2950_v43, 1  ;;  %v2946_v20 = vmax.f32 %v2944_v10, %v2945_v56  ;;  %v2963_v49 = vrot.slane %v2962_v47, 1  ;;  %v1960_v56 = vperm.slane %v1701_v2, 0 }
 0x30f   : > { %v2250_v34 = vpack.c.bf16 %v2218_v16, %v2218_v16  ;;  %v2909_v7 = vadd.f32 %v4422_v8, %v2874_v1  ;;  %v2968_v29 = vmax.f32 %v2966_v22, %v2967_v37  ;;  %v2939_v16 = vrot.slane %v2938_v18, 1 }
 0x310   : > { %v2114_v35 = vpop.f32.mrf.mxu1  ;;  %v4449_v61 = vpop.f32.mrf.mxu3  ;;  %v1959_v1 = vperm.slane %v1700_v54, 0  ;;  %v2952_v17 = vmax.f32 %v2950_v43, %v2951_v3  ;;  %v2964_v10 = vmax.f32 %v2962_v47, %v2963_v49 }
 0x311   : > { %v2376_v13 = vunpack.c.l.b16 %v2250_v34  ;;  %v2152_v57 = vadd.f32 %v2114_v35, %v2021_v12  ;;  %v2971_v44 = vrot.slane %v2909_v7, 4  ;;  %v2957_v12 = vrot.slane %v2956_v52, 1 }
 0x312   : > { %v2969_v60 = vrot.slane %v2968_v29, 1  ;;  %v2023_v21 = vadd.f32 %v1959_v1, %v4366_v48 }
 0x313   : > { %v2394_v26 = vpack.c.b16 %v2376_v13, %v2375_v9  ;;  %v2972_v6 = vmax.f32 %v2909_v7, %v2971_v44  ;;  %v2187_v39 = vadd.f32 %v4206_v31, %v2152_v57  ;;  %v2940_v7 = vmax.f32 %v2938_v18, %v2939_v16  ;;  %v4468_v5 = vpop.f32.mrf.mxu0 }
 0x314   : > { %v2805_v4 = vpop.f32.mrf.mxu2  ;;  %v2958_v57 = vmax.f32 %v2956_v52, %v2957_v12  ;;  %v2970_v43 = vmax.f32 %v2968_v29, %v2969_v60 }
 0x315   : > { %3511 = vmatmul.msk.bf16.gmra.mxu3 %vm1305_vm2, %v2394_v26  ;;  %v2973_v53 = vrot.slane %v2972_v6, 2  ;;  %v2875_v33 = vadd.f32 %v2805_v4, %v2744_v58  ;;  %v2219_v46 = vmax.f32 %v2187_v39, 0.0  ;;  %v3160_v44 = vsel %vm3159_vm3, %v2946_v20, %v2940_v7 }
 0x316   : > { %v3162_v26 = vsel %vm3161_vm4, %v2952_v17, %v3160_v44  ;;  %v2294_v7 = vrot.slane %v4141_v0, 1  ;;  %v2550_v44 = vperm.slane %v4141_v0, 0 }
 0x317   : > { %v2910_v45 = vadd.f32 %v4422_v8, %v2875_v33  ;;  %v2974_v51 = vmax.f32 %v2972_v6, %v2973_v53  ;;  %v2251_v41 = vpack.c.bf16 %v2219_v46, %v2219_v46  ;;  %v3164_v4 = vsel %vm3163_vm5, %v2958_v57, %v3162_v26 }
 0x318   : > { %v2116_v63 = vpop.f32.mrf.mxu1  ;;  %v4459_v11 = vpop.f32.mrf.mxu3  ;;  %v3166_v52 = vsel %vm3165_vm6, %v2964_v10, %v3164_v4  ;;  %v2298_v26 = vrot.slane %v4141_v0, 5 }
 0x319   : > { %v2153_v50 = vadd.f32 %v2116_v63, %v2022_v38  ;;  %v2977_v42 = vrot.slane %v2910_v45, 4  ;;  %3550 = vmatmul.msk.bf16.gmra.mxu2 %vm1305_vm2, %v4024_v23  ;;  %v2975_v35 = vrot.slane %v2974_v51, 1  ;;  %v2377_v48 = vunpack.c.l.b16 %v2251_v41 }
 0x31a   : > { %v3168_v33 = vsel %vm3167_vm7, %v2970_v43, %v3166_v52  ;;  %v2024_v63 = vadd.f32 %v1960_v56, %v4372_v14  ;;  %v2296_v41 = vrot.slane %v4141_v0, 3 }
 0x31b   : > { %v2188_v34 = vadd.f32 %v4206_v31, %v2153_v50  ;;  %v2978_v22 = vmax.f32 %v2910_v45, %v2977_v42  ;;  %v2976_v36 = vmax.f32 %v2974_v51, %v2975_v35  ;;  %v4487_v46 = vpop.f32.mrf.mxu0  ;;  %v2295_v35 = vrot.slane %v4141_v0, 2 }
 0x31c   : > { %v4465_v13 = vpop.f32.mrf.mxu2 }
 0x31d   : > { %v2220_v9 = vmax.f32 %v2188_v34, 0.0  ;;  %v2979_v23 = vrot.slane %v2978_v22, 2  ;;  %v3170_v47 = vsel %vm3169_vm8, %v2976_v36, %v3168_v33 }
 0x31f   : > { %v2252_v19 = vpack.c.bf16 %v2220_v9, %v2220_v9  ;;  %v2980_v37 = vmax.f32 %v2978_v22, %v2979_v23  ;;  %v2297_v9 = vrot.slane %v4141_v0, 4  ;;  %v2552_v23 = vperm.slane %v2295_v35, 0 }
 0x320   : > { %v2119_v6 = vpop.f32.mrf.mxu1  ;;  %v2489_v58 = vpop.f32.mrf.mxu3 }
 0x321   : > { %v2378_v18 = vunpack.c.l.b16 %v2252_v19  ;;  %v2154_v39 = vadd.f32 %v2119_v6, %v2023_v21  ;;  %v2981_v54 = vrot.slane %v2980_v37, 1  ;;  %v2551_v21 = vperm.slane %v2294_v7, 0 }
 0x322   : > { %v2553_v19 = vperm.slane %v2296_v41, 0  ;;  %v2616_v43 = vadd.f32 %v2552_v23, %v4459_v11  ;;  %v2614_v6 = vadd.f32 %v2550_v44, %v4436_v27 }
 0x323   : > { %v2395_v53 = vpack.c.b16 %v2378_v18, %v2377_v48  ;;  %v2982_v38 = vmax.f32 %v2980_v37, %v2981_v54  ;;  %v2189_v3 = vadd.f32 %v4206_v31, %v2154_v39  ;;  %v3619_v31 = vld [vmem:[%s4629_s11] ss:$0 sm:$0xff]  ;;  %v4494_v60 = vpop.f32.mrf.mxu0  ;;  %v2615_v10 = vadd.f32 %v2551_v21, %v4449_v61 }
 0x324   : > { %v2810_v29 = vpop.f32.mrf.mxu2  ;;  %v2554_v37 = vperm.slane %v2297_v9, 0  ;;  %v2617_v36 = vadd.f32 %v2553_v19, %v2489_v58  ;;  %v2555_v54 = vperm.slane %v2298_v26, 0  ;;  %v2747_v61 = vadd.f32 %v4417_v15, %v2616_v43 }
 0x325   : > { %3512 = vmatmul.msk.bf16.gmra.mxu3 %vm1305_vm2, %v2395_v53  ;;  %v3172_v45 = vsel %vm3171_vm9, %v2982_v38, %v3170_v47  ;;  %v2221_v50 = vmax.f32 %v2189_v3, 0.0  ;;  %v2746_v4 = vadd.f32 %v4398_v28, %v2615_v10  ;;  %v2745_v52 = vadd.f32 %v4388_v24, %v2614_v6 }
 0x326   : > { %3198 = vst [vmem:[%s4479_s21] sm:$0xff] %v3172_v45  ;;  %v2299_v47 = vrot.slane %v4141_v0, 6 }
 0x327   : > { %v2253_v12 = vpack.c.bf16 %v2221_v50, %v2221_v50  ;;  %v2877_v53 = vadd.f32 %v2810_v29, %v2746_v4  ;;  %v2876_v58 = vadd.f32 %v4465_v13, %v2745_v52 }
 0x328   : > { %v2121_v16 = vpop.f32.mrf.mxu1  ;;  %v2492_v51 = vpop.f32.mrf.mxu3 }
 0x329   : > { %v2155_v1 = vadd.f32 %v2121_v16, %v2024_v63  ;;  %3551 = vmatmul.msk.bf16.gmra.mxu2 %vm1305_vm2, %v4050_v25  ;;  %v2379_v34 = vunpack.c.l.b16 %v2253_v12  ;;  %v2618_v18 = vadd.f32 %v2554_v37, %v2492_v51  ;;  %v2912_v28 = vadd.f32 %v4422_v8, %v2877_v53 }
 0x32a   : > { %v2911_v45 = vadd.f32 %v4422_v8, %v2876_v58  ;;  %v2556_v63 = vperm.slane %v2299_v47, 0 }
 0x32b   : > { %v2190_v2 = vadd.f32 %v3619_v31, %v2155_v1  ;;  %v4508_v48 = vpop.f32.mrf.mxu0  ;;  %v2749_v27 = vadd.f32 %v4452_v40, %v2618_v18  ;;  %v2989_v51 = vrot.slane %v2912_v28, 4 }
 0x32c   : > { %v2813_v20 = vpop.f32.mrf.mxu2 }
 0x32d   : > { %v2222_v42 = vmax.f32 %v2190_v2, 0.0  ;;  %v2878_v38 = vadd.f32 %v2813_v20, %v2747_v61  ;;  %v2983_v2 = vrot.slane %v2911_v45, 4 }
 0x32f   : > { %v2254_v49 = vpack.c.bf16 %v2222_v42, %v2222_v42  ;;  %v2913_v24 = vadd.f32 %v4422_v8, %v2878_v38  ;;  %v2300_v42 = vrot.slane %v4141_v0, 7  ;;  %v2984_v7 = vmax.f32 %v2911_v45, %v2983_v2 }
 0x330   : > { %v2494_v14 = vpop.f32.mrf.mxu3 }
 0x331   : > { %v2380_v17 = vunpack.c.l.b16 %v2254_v49  ;;  %v2619_v33 = vadd.f32 %v2555_v54, %v2494_v14  ;;  %v2990_v49 = vmax.f32 %v2912_v28, %v2989_v51  ;;  %v2985_v19 = vrot.slane %v2984_v7, 2 }
 0x333   : > { %v2396_v22 = vpack.c.b16 %v2380_v17, %v2379_v34  ;;  %v2750_v15 = vadd.f32 %v4468_v5, %v2619_v33  ;;  %v4522_v40 = vpop.f32.mrf.mxu0  ;;  %v2995_v5 = vrot.slane %v2913_v24, 4  ;;  %v2991_v21 = vrot.slane %v2990_v49, 2 }
 0x334   : > { %v2815_v25 = vpop.f32.mrf.mxu2  ;;  %v2986_v54 = vmax.f32 %v2984_v7, %v2985_v19  ;;  %v2302_v19 = vrot.slane %v4152_v32, 2 }
 0x335   : > { %3513 = vmatmul.msk.bf16.gmra.mxu3 %vm1305_vm2, %v2396_v22  ;;  %v2996_v17 = vmax.f32 %v2913_v24, %v2995_v5  ;;  %v2992_v37 = vmax.f32 %v2990_v49, %v2991_v21 }
 0x336   : > { %v2987_v47 = vrot.slane %v2986_v54, 1 }
 0x337   : > { %v2997_v10 = vrot.slane %v2996_v17, 2 }
 0x338   : > { %v2497_v57 = vpop.f32.mrf.mxu3 }
 0x339   : > { %3552 = vmatmul.msk.bf16.gmra.mxu2 %vm1305_vm2, %v4066_v30  ;;  %v2748_v30 = vadd.f32 %v4442_v55, %v2617_v36  ;;  %v2620_v50 = vadd.f32 %v2556_v63, %v2497_v57 }
 0x33b   : > { %v2879_v56 = vadd.f32 %v2815_v25, %v2748_v30  ;;  %v2751_v34 = vadd.f32 %v4487_v46, %v2620_v50  ;;  %v2557_v25 = vperm.slane %v2300_v42, 0  ;;  %v2993_v30 = vrot.slane %v2992_v37, 1 }
 0x33c   : > { %v2818_v39 = vpop.f32.mrf.mxu2 }
 0x33d   : > { %v2880_v3 = vadd.f32 %v2818_v39, %v2749_v27  ;;  %v2914_v55 = vadd.f32 %v4422_v8, %v2879_v56  ;;  %v2998_v39 = vmax.f32 %v2996_v17, %v2997_v10  ;;  %v2301_v10 = vrot.slane %v4152_v32, 1 }
 0x33f   : > { %v2915_v13 = vadd.f32 %v4422_v8, %v2880_v3  ;;  %v3001_v12 = vrot.slane %v2914_v55, 4  ;;  %v2999_v58 = vrot.slane %v2998_v39, 1 }
 0x340   : > { %v2499_v11 = vpop.f32.mrf.mxu3 }
 0x341   : > { %v3007_v20 = vrot.slane %v2915_v13, 4  ;;  %v3002_v35 = vmax.f32 %v2914_v55, %v3001_v12  ;;  %v2621_v57 = vadd.f32 %v2557_v25, %v2499_v11  ;;  %v3000_v55 = vmax.f32 %v2998_v39, %v2999_v58 }
 0x342   : > { %v2558_v39 = vperm.slane %v4152_v32, 0 }
 0x343   : > { %v3008_v9 = vmax.f32 %v2915_v13, %v3007_v20  ;;  %v3003_v26 = vrot.slane %v3002_v35, 2  ;;  %v2752_v18 = vadd.f32 %v4494_v60, %v2621_v57  ;;  %v2994_v60 = vmax.f32 %v2992_v37, %v2993_v30 }
 0x344   : > { %v2820_v29 = vpop.f32.mrf.mxu2  ;;  %v2988_v13 = vmax.f32 %v2986_v54, %v2987_v47  ;;  %v2559_v37 = vperm.slane %v2301_v10, 0 }
 0x345   : > { %v2881_v16 = vadd.f32 %v2820_v29, %v2750_v15  ;;  %v3009_v43 = vrot.slane %v3008_v9, 2  ;;  %v3004_v61 = vmax.f32 %v3002_v35, %v3003_v26 }
 0x346   : > { %v3173_v5 = vsel %vm3159_vm3, %v2994_v60, %v2988_v13 }
 0x347   : > { %v2916_v1 = vadd.f32 %v4422_v8, %v2881_v16  ;;  %v3010_v33 = vmax.f32 %v3008_v9, %v3009_v43  ;;  %v3005_v3 = vrot.slane %v3004_v61, 1  ;;  %v3174_v20 = vsel %vm3161_vm4, %v3000_v55, %v3173_v5 }
 0x348   : > { %v4526_v31 = vpop.f32.mrf.mxu3  ;;  %v2304_v43 = vrot.slane %v4152_v32, 4 }
 0x349   : > { %3553 = vmatmul.msk.bf16.gmra.mxu2 %vm1305_vm2, %v4080_v59  ;;  %v3013_v14 = vrot.slane %v2916_v1, 4  ;;  %v4535_v59 = vpop.f32.mrf.mxu0  ;;  %v3011_v24 = vrot.slane %v3010_v33, 1  ;;  %v3006_v51 = vmax.f32 %v3004_v61, %v3005_v3  ;;  %v2305_v61 = vrot.slane %v4152_v32, 5 }
 0x34b   : > { %v3014_v23 = vmax.f32 %v2916_v1, %v3013_v14  ;;  %v3012_v1 = vmax.f32 %v3010_v33, %v3011_v24  ;;  %v3175_v14 = vsel %vm3163_vm5, %v3006_v51, %v3174_v20  ;;  %v2622_v33 = vadd.f32 %v2558_v39, %v4526_v31 }
 0x34c   : > { %v2823_v22 = vpop.f32.mrf.mxu2  ;;  %v2306_v31 = vrot.slane %v4152_v32, 6 }
 0x34d   : > { %v2882_v41 = vadd.f32 %v2823_v22, %v2751_v34  ;;  %v3015_v6 = vrot.slane %v3014_v23, 2  ;;  %v3176_v17 = vsel %vm3165_vm6, %v3012_v1, %v3175_v14  ;;  %v2753_v3 = vadd.f32 %v4508_v48, %v2622_v33 }
 0x34f   : > { %v2917_v0 = vadd.f32 %v4422_v8, %v2882_v41  ;;  %v3016_v11 = vmax.f32 %v3014_v23, %v3015_v6 }
 0x350   : > { %v4533_v44 = vpop.f32.mrf.mxu3 }
 0x351   : > { %v3019_v46 = vrot.slane %v2917_v0, 4  ;;  %v2704_v15 = vpop.f32.mrf.mxu0  ;;  %v3017_v29 = vrot.slane %v3016_v11, 1 }
 0x353   : > { %v3020_v36 = vmax.f32 %v2917_v0, %v3019_v46  ;;  %v3018_v2 = vmax.f32 %v3016_v11, %v3017_v29  ;;  %v2303_v46 = vrot.slane %v4152_v32, 3 }
 0x354   : > { %v2825_v4 = vpop.f32.mrf.mxu2 }
 0x355   : > { %v3021_v52 = vrot.slane %v3020_v36, 2  ;;  %v2883_v53 = vadd.f32 %v2825_v4, %v2752_v18  ;;  %v3177_v22 = vsel %vm3167_vm7, %v3018_v2, %v3176_v17  ;;  %v2560_v18 = vperm.slane %v2302_v19, 0 }
 0x356   : > { %v2623_v4 = vadd.f32 %v2559_v37, %v4533_v44  ;;  %v2561_v54 = vperm.slane %v2303_v46, 0  ;;  %v2307_v17 = vrot.slane %v4152_v32, 7 }
 0x357   : > { %v2918_v38 = vadd.f32 %v4422_v8, %v2883_v53  ;;  %v3022_v56 = vmax.f32 %v3020_v36, %v3021_v52  ;;  %v2562_v53 = vperm.slane %v2304_v43, 0 }
 0x358   : > { %v2507_v27 = vpop.f32.mrf.mxu3  ;;  %v2754_v58 = vadd.f32 %v4522_v40, %v2623_v4 }
 0x359   : > { %v3025_v28 = vrot.slane %v2918_v38, 4  ;;  %v3023_v63 = vrot.slane %v3022_v56, 1  ;;  %v2707_v35 = vpop.f32.mrf.mxu0  ;;  %v2624_v52 = vadd.f32 %v2560_v18, %v2507_v27 }
 0x35b   : > { %v3026_v45 = vmax.f32 %v2918_v38, %v3025_v28  ;;  %v3024_v49 = vmax.f32 %v3022_v56, %v3023_v63  ;;  %v2563_v56 = vperm.slane %v2305_v61, 0  ;;  %v2755_v47 = vadd.f32 %v4535_v59, %v2624_v52 }
 0x35c   : > { %v2828_v16 = vpop.f32.mrf.mxu2 }
 0x35d   : > { %v3027_v50 = vrot.slane %v3026_v45, 2  ;;  %v3178_v25 = vsel %vm3169_vm8, %v3024_v49, %v3177_v22  ;;  %v2884_v27 = vadd.f32 %v2828_v16, %v2753_v3 }
 0x35f   : > { %v3028_v12 = vmax.f32 %v3026_v45, %v3027_v50  ;;  %v2919_v48 = vadd.f32 %v4422_v8, %v2884_v27 }
 0x360   : > { %v2509_v42 = vpop.f32.mrf.mxu3 }
 0x361   : > { %v3029_v34 = vrot.slane %v3028_v12, 1  ;;  %v2709_v23 = vpop.f32.mrf.mxu0  ;;  %v2625_v30 = vadd.f32 %v2561_v54, %v2509_v42  ;;  %v3031_v14 = vrot.slane %v2919_v48, 4 }
 0x363   : > { %v3030_v7 = vmax.f32 %v3028_v12, %v3029_v34  ;;  %v2756_v44 = vadd.f32 %v2704_v15, %v2625_v30  ;;  %v2564_v15 = vperm.slane %v2306_v31, 0 }
 0x364   : > { %v2830_v41 = vpop.f32.mrf.mxu2 }
 0x365   : > { %v3179_v9 = vsel %vm3171_vm9, %v3030_v7, %v3178_v25  ;;  %v2885_v28 = vadd.f32 %v2830_v41, %v2754_v58 }
 0x366   : > { %3199 = vst [vmem:[%s4479_s21 + $0x8] sm:$0xff] %v3179_v9 }
 0x367   : > { %v2920_v51 = vadd.f32 %v4422_v8, %v2885_v28 }
 0x368   : > { %v2512_v21 = vpop.f32.mrf.mxu3 }
 0x369   : > { %v2712_v36 = vpop.f32.mrf.mxu0  ;;  %v2626_v11 = vadd.f32 %v2562_v53, %v2512_v21  ;;  %v3037_v16 = vrot.slane %v2920_v51, 4 }
 0x36b   : > { %v2757_v45 = vadd.f32 %v2707_v35, %v2626_v11  ;;  %v3038_v7 = vmax.f32 %v2920_v51, %v3037_v16 }
 0x36c   : > { %v2833_v57 = vpop.f32.mrf.mxu2 }
 0x36d   : > { %v2886_v29 = vadd.f32 %v2833_v57, %v2755_v47  ;;  %v3032_v57 = vmax.f32 %v2919_v48, %v3031_v14 }
 0x36f   : > { %v2921_v50 = vadd.f32 %v4422_v8, %v2886_v29  ;;  %v3033_v18 = vrot.slane %v3032_v57, 2 }
 0x370   : > { %v2514_v0 = vpop.f32.mrf.mxu3 }
 0x371   : > { %v2627_v24 = vadd.f32 %v2563_v56, %v2514_v0  ;;  %v2714_v63 = vpop.f32.mrf.mxu0  ;;  %v3043_v49 = vrot.slane %v2921_v50, 4  ;;  %v2565_v0 = vperm.slane %v2307_v17, 0  ;;  %v3034_v11 = vmax.f32 %v3032_v57, %v3033_v18 }
 0x372   : > { %v2311_v18 = vrot.slane %v4164_v62, 4 }
 0x373   : > { %v2758_v40 = vadd.f32 %v2709_v23, %v2627_v24  ;;  %v3044_v9 = vmax.f32 %v2921_v50, %v3043_v49 }
 0x374   : > { %v2835_v26 = vpop.f32.mrf.mxu2 }
 0x375   : > { %v2887_v55 = vadd.f32 %v2835_v26, %v2756_v44  ;;  %v3039_v26 = vrot.slane %v3038_v7, 2 }
 0x377   : > { %v2922_v1 = vadd.f32 %v4422_v8, %v2887_v55  ;;  %v3040_v54 = vmax.f32 %v3038_v7, %v3039_v26  ;;  %v2308_v26 = vrot.slane %v4164_v62, 1 }
 0x378   : > { %v2517_v6 = vpop.f32.mrf.mxu3 }
 0x379   : > { %v2628_v12 = vadd.f32 %v2564_v15, %v2517_v6  ;;  %v3049_v34 = vrot.slane %v2922_v1, 4  ;;  %v4568_v41 = vpop.f32.mrf.mxu0  ;;  %v3045_v6 = vrot.slane %v3044_v9, 2  ;;  %v3041_v28 = vrot.slane %v3040_v54, 1 }
 0x37b   : > { %v2759_v25 = vadd.f32 %v2712_v36, %v2628_v12  ;;  %v3050_v23 = vmax.f32 %v2922_v1, %v3049_v34  ;;  %v3046_v33 = vmax.f32 %v3044_v9, %v3045_v6  ;;  %v2310_v6 = vrot.slane %v4164_v62, 3 }
 0x37c   : > { %v2838_v38 = vpop.f32.mrf.mxu2 }
 0x37d   : > { %v2888_v13 = vadd.f32 %v2838_v38, %v2757_v45  ;;  %v3051_v39 = vrot.slane %v3050_v23, 2  ;;  %v3035_v45 = vrot.slane %v3034_v11, 1 }
 0x37f   : > { %v2923_v2 = vadd.f32 %v4422_v8, %v2888_v13  ;;  %v3052_v38 = vmax.f32 %v3050_v23, %v3051_v39  ;;  %v3036_v1 = vmax.f32 %v3034_v11, %v3035_v45  ;;  %v2567_v39 = vperm.slane %v2308_v26, 0 }
 0x380   : > { %v2519_v60 = vpop.f32.mrf.mxu3 }
 0x381   : > { %v3055_v22 = vrot.slane %v2923_v2, 4  ;;  %v2629_v46 = vadd.f32 %v2565_v0, %v2519_v60  ;;  %v2719_v47 = vpop.f32.mrf.mxu0  ;;  %v3047_v60 = vrot.slane %v3046_v33, 1  ;;  %v3053_v27 = vrot.slane %v3052_v38, 1 }
 0x383   : > { %v3056_v19 = vmax.f32 %v2923_v2, %v3055_v22  ;;  %v2760_v53 = vadd.f32 %v2714_v63, %v2629_v46  ;;  %v3042_v63 = vmax.f32 %v3040_v54, %v3041_v28  ;;  %v3048_v50 = vmax.f32 %v3046_v33, %v3047_v60 }
 0x384   : > { %v2840_v59 = vpop.f32.mrf.mxu2  ;;  %v3054_v15 = vmax.f32 %v3052_v38, %v3053_v27  ;;  %v2566_v54 = vperm.slane %v4164_v62, 0 }
 0x385   : > { %v2889_v5 = vadd.f32 %v2840_v59, %v2758_v40  ;;  %v3057_v4 = vrot.slane %v3056_v19, 2  ;;  %v3180_v16 = vsel %vm3159_vm3, %v3042_v63, %v3036_v1 }
 0x386   : > { %v3181_v14 = vsel %vm3161_vm4, %v3048_v50, %v3180_v16 }
 0x387   : > { %v2924_v42 = vadd.f32 %v4422_v8, %v2889_v5  ;;  %v3058_v3 = vmax.f32 %v3056_v19, %v3057_v4  ;;  %v3182_v17 = vsel %vm3163_vm5, %v3054_v15, %v3181_v14 }
 0x388   : > { %v4565_v20 = vpop.f32.mrf.mxu3 }
 0x389   : > { %v3061_v35 = vrot.slane %v2924_v42, 4  ;;  %v3059_v31 = vrot.slane %v3058_v3, 1  ;;  %v2722_v49 = vpop.f32.mrf.mxu0  ;;  %v2630_v11 = vadd.f32 %v2566_v54, %v4565_v20 }
 0x38b   : > { %v3062_v43 = vmax.f32 %v2924_v42, %v3061_v35  ;;  %v3060_v2 = vmax.f32 %v3058_v3, %v3059_v31  ;;  %v2761_v60 = vadd.f32 %v4568_v41, %v2630_v11 }
 0x38c   : > { %v2843_v21 = vpop.f32.mrf.mxu2 }
 0x38d   : > { %v2890_v10 = vadd.f32 %v2843_v21, %v2759_v25  ;;  %v3063_v61 = vrot.slane %v3062_v43, 2  ;;  %v3183_v7 = vsel %vm3165_vm6, %v3060_v2, %v3182_v17  ;;  %v2314_v17 = vrot.slane %v4164_v62, 7 }
 0x38f   : > { %v2925_v37 = vadd.f32 %v4422_v8, %v2890_v10  ;;  %v3064_v24 = vmax.f32 %v3062_v43, %v3063_v61  ;;  %v2309_v43 = vrot.slane %v4164_v62, 2 }
 0x390   : > { %v4571_v32 = vpop.f32.mrf.mxu3 }
 0x391   : > { %v3067_v36 = vrot.slane %v2925_v37, 4  ;;  %v3065_v51 = vrot.slane %v3064_v24, 1  ;;  %v2724_v0 = vpop.f32.mrf.mxu0  ;;  %v2631_v61 = vadd.f32 %v2567_v39, %v4571_v32 }
 0x393   : > { %v3068_v52 = vmax.f32 %v2925_v37, %v3067_v36  ;;  %v3066_v12 = vmax.f32 %v3064_v24, %v3065_v51  ;;  %v2568_v36 = vperm.slane %v2309_v43, 0  ;;  %v2762_v3 = vadd.f32 %v2719_v47, %v2631_v61 }
 0x394   : > { %v2845_v30 = vpop.f32.mrf.mxu2 }
 0x395   : > { %v3069_v58 = vrot.slane %v3068_v52, 2  ;;  %v2891_v56 = vadd.f32 %v2845_v30, %v2760_v53  ;;  %v3184_v35 = vsel %vm3167_vm7, %v3066_v12, %v3183_v7  ;;  %v2312_v53 = vrot.slane %v4164_v62, 5 }
 0x396   : > { %v2570_v30 = vperm.slane %v2311_v18, 0 }
 0x397   : > { %v2926_v44 = vadd.f32 %v4422_v8, %v2891_v56  ;;  %v3070_v29 = vmax.f32 %v3068_v52, %v3069_v58  ;;  %v2569_v52 = vperm.slane %v2310_v6, 0  ;;  %v2571_v28 = vperm.slane %v2312_v53, 0 }
 0x398   : > { %v2527_v13 = vpop.f32.mrf.mxu3 }
 0x399   : > { %v3073_v55 = vrot.slane %v2926_v44, 4  ;;  %v3071_v59 = vrot.slane %v3070_v29, 1  ;;  %v2727_v46 = vpop.f32.mrf.mxu0  ;;  %v2632_v33 = vadd.f32 %v2568_v36, %v2527_v13  ;;  %v2313_v13 = vrot.slane %v4164_v62, 6 }
 0x39b   : > { %v3074_v40 = vmax.f32 %v2926_v44, %v3073_v55  ;;  %v3072_v34 = vmax.f32 %v3070_v29, %v3071_v59  ;;  %v2763_v44 = vadd.f32 %v2722_v49, %v2632_v33  ;;  %v2572_v15 = vperm.slane %v2313_v13, 0 }
 0x39c   : > { %v2848_v48 = vpop.f32.mrf.mxu2 }
 0x39d   : > { %v3075_v5 = vrot.slane %v3074_v40, 2  ;;  %v3185_v9 = vsel %vm3169_vm8, %v3072_v34, %v3184_v35  ;;  %v2892_v31 = vadd.f32 %v2848_v48, %v2761_v60 }
 0x39f   : > { %v3076_v42 = vmax.f32 %v3074_v40, %v3075_v5  ;;  %v2927_v1 = vadd.f32 %v4422_v8, %v2892_v31 }
 0x3a0   : > { %v2529_v21 = vpop.f32.mrf.mxu3 }
 0x3a1   : > { %v3077_v22 = vrot.slane %v3076_v42, 1  ;;  %v2633_v38 = vadd.f32 %v2569_v52, %v2529_v21  ;;  %v2729_v24 = vpop.f32.mrf.mxu0  ;;  %v3079_v14 = vrot.slane %v2927_v1, 4 }
 0x3a3   : > { %v3078_v25 = vmax.f32 %v3076_v42, %v3077_v22  ;;  %v2764_v27 = vadd.f32 %v2724_v0, %v2633_v38 }
 0x3a4   : > { %v2850_v57 = vpop.f32.mrf.mxu2 }
 0x3a5   : > { %v3186_v23 = vsel %vm3171_vm9, %v3078_v25, %v3185_v9  ;;  %v2893_v29 = vadd.f32 %v2850_v57, %v2762_v3 }
 0x3a6   : > { %3200 = vst [vmem:[%s4479_s21 + $0x10] sm:$0xff] %v3186_v23  ;;  %v3080_v23 = vmax.f32 %v2927_v1, %v3079_v14 }
 0x3a7   : > { %v2928_v40 = vadd.f32 %v4422_v8, %v2893_v29 }
 0x3a8   : > { %v2532_v19 = vpop.f32.mrf.mxu3  ;;  %v3081_v39 = vrot.slane %v3080_v23, 2 }
 0x3a9   : > { %v2634_v58 = vadd.f32 %v2570_v30, %v2532_v19  ;;  %v3085_v48 = vrot.slane %v2928_v40, 4  ;;  %v2732_v42 = vpop.f32.mrf.mxu0 }
 0x3aa   : > { %v3082_v38 = vmax.f32 %v3080_v23, %v3081_v39 }
 0x3ab   : > { %v2765_v55 = vadd.f32 %v2727_v46, %v2634_v58  ;;  %v3086_v7 = vmax.f32 %v2928_v40, %v3085_v48 }
 0x3ac   : > { %v2853_v10 = vpop.f32.mrf.mxu2 }
 0x3ad   : > { %v2894_v32 = vadd.f32 %v2853_v10, %v2763_v44  ;;  %v2573_v10 = vperm.slane %v2314_v17, 0  ;;  %v3087_v46 = vrot.slane %v3086_v7, 2 }
 0x3af   : > { %v2929_v47 = vadd.f32 %v4422_v8, %v2894_v32  ;;  %v3088_v61 = vmax.f32 %v3086_v7, %v3087_v46 }
 0x3b0   : > { %v2534_v4 = vpop.f32.mrf.mxu3 }
 0x3b1   : > { %v2635_v45 = vadd.f32 %v2571_v28, %v2534_v4  ;;  %v3091_v49 = vrot.slane %v2929_v47, 4  ;;  %v2734_v4 = vpop.f32.mrf.mxu0 }
 0x3b3   : > { %v2766_v50 = vadd.f32 %v2729_v24, %v2635_v45  ;;  %v3092_v9 = vmax.f32 %v2929_v47, %v3091_v49  ;;  %v3089_v24 = vrot.slane %v3088_v61, 1 }
 0x3b4   : > { %v2855_v37 = vpop.f32.mrf.mxu2 }
 0x3b5   : > { %v2895_v63 = vadd.f32 %v2855_v37, %v2764_v27  ;;  %v3093_v18 = vrot.slane %v3092_v9, 2  ;;  %v3083_v27 = vrot.slane %v3082_v38, 1 }
 0x3b7   : > { %v2930_v41 = vadd.f32 %v4422_v8, %v2895_v63  ;;  %v3094_v30 = vmax.f32 %v3092_v9, %v3093_v18  ;;  %v3090_v63 = vmax.f32 %v3088_v61, %v3089_v24 }
 0x3b8   : > { %v2537_v51 = vpop.f32.mrf.mxu3 }
 0x3b9   : > { %v2636_v16 = vadd.f32 %v2572_v15, %v2537_v51  ;;  %v3097_v34 = vrot.slane %v2930_v41, 4  ;;  %v3095_v29 = vrot.slane %v3094_v30, 1 }
 0x3bb   : > { %v2767_v25 = vadd.f32 %v2732_v42, %v2636_v16  ;;  %v3098_v0 = vmax.f32 %v2930_v41, %v3097_v34 }
 0x3bc   : > { %v2858_v56 = vpop.f32.mrf.mxu2 }
 0x3bd   : > { %v2896_v20 = vadd.f32 %v2858_v56, %v2765_v55  ;;  %v3099_v62 = vrot.slane %v3098_v0, 2 }
 0x3bf   : > { %v2931_v2 = vadd.f32 %v4422_v8, %v2896_v20  ;;  %v3100_v58 = vmax.f32 %v3098_v0, %v3099_v62  ;;  %v3096_v20 = vmax.f32 %v3094_v30, %v3095_v29 }
 0x3c0   : > { %v2539_v21 = vpop.f32.mrf.mxu3 }
 0x3c1   : > { %v3103_v22 = vrot.slane %v2931_v2, 4  ;;  %v2637_v43 = vadd.f32 %v2573_v10, %v2539_v21  ;;  %v3101_v32 = vrot.slane %v3100_v58, 1 }
 0x3c3   : > { %v3104_v26 = vmax.f32 %v2931_v2, %v3103_v22  ;;  %v2768_v33 = vadd.f32 %v2734_v4, %v2637_v43  ;;  %v3102_v47 = vmax.f32 %v3100_v58, %v3101_v32 }
 0x3c4   : > { %v2860_v59 = vpop.f32.mrf.mxu2 }
 0x3c5   : > { %v2897_v5 = vadd.f32 %v2860_v59, %v2766_v50  ;;  %v3105_v54 = vrot.slane %v3104_v26, 2  ;;  %v3084_v50 = vmax.f32 %v3082_v38, %v3083_v27 }
 0x3c7   : > { %v2932_v12 = vadd.f32 %v4422_v8, %v2897_v5  ;;  %v3106_v28 = vmax.f32 %v3104_v26, %v3105_v54  ;;  %v3187_v41 = vsel %vm3159_vm3, %v3090_v63, %v3084_v50 }
 0x3c8   : > { %v3188_v5 = vsel %vm3161_vm4, %v3096_v20, %v3187_v41 }
 0x3c9   : > { %v3109_v35 = vrot.slane %v2932_v12, 4  ;;  %v3107_v31 = vrot.slane %v3106_v28, 1  ;;  %v3189_v48 = vsel %vm3163_vm5, %v3102_v47, %v3188_v5 }
 0x3cb   : > { %v3110_v37 = vmax.f32 %v2932_v12, %v3109_v35  ;;  %v3108_v1 = vmax.f32 %v3106_v28, %v3107_v31 }
 0x3cc   : > { %v2863_v57 = vpop.f32.mrf.mxu2 }
 0x3cd   : > { %v2898_v19 = vadd.f32 %v2863_v57, %v2767_v25  ;;  %v3111_v52 = vrot.slane %v3110_v37, 2  ;;  %v3190_v12 = vsel %vm3165_vm6, %v3108_v1, %v3189_v48 }
 0x3cf   : > { %v2933_v6 = vadd.f32 %v4422_v8, %v2898_v19  ;;  %v3112_v44 = vmax.f32 %v3110_v37, %v3111_v52 }
 0x3d1   : > { %v3115_v36 = vrot.slane %v2933_v6, 4  ;;  %v3113_v13 = vrot.slane %v3112_v44, 1 }
 0x3d3   : > { %v3116_v53 = vmax.f32 %v2933_v6, %v3115_v36  ;;  %v3114_v15 = vmax.f32 %v3112_v44, %v3113_v13 }
 0x3d4   : > { %v2865_v11 = vpop.f32.mrf.mxu2 }
 0x3d5   : > { %v3117_v56 = vrot.slane %v3116_v53, 2  ;;  %v2899_v3 = vadd.f32 %v2865_v11, %v2768_v33  ;;  %v3191_v42 = vsel %vm3167_vm7, %v3114_v15, %v3190_v12 }
 0x3d7   : > { %v2934_v60 = vadd.f32 %v4422_v8, %v2899_v3  ;;  %v3118_v45 = vmax.f32 %v3116_v53, %v3117_v56 }
 0x3d9   : > { %v3121_v55 = vrot.slane %v2934_v60, 4  ;;  %v3119_v40 = vrot.slane %v3118_v45, 1 }
 0x3db   : > { %v3122_v51 = vmax.f32 %v2934_v60, %v3121_v55  ;;  %v3120_v2 = vmax.f32 %v3118_v45, %v3119_v40 }
 0x3dd   : > { %v3123_v59 = vrot.slane %v3122_v51, 2  ;;  %v3192_v14 = vsel %vm3169_vm8, %v3120_v2, %v3191_v42 }
 0x3df   : > { %v3124_v8 = vmax.f32 %v3122_v51, %v3123_v59 }
 0x3e1   : > { %v3125_v16 = vrot.slane %v3124_v8, 1 }
 0x3e3   : > { %v3126_v49 = vmax.f32 %v3124_v8, %v3125_v16 }
 0x3e5   : > { %v3193_v34 = vsel %vm3171_vm9, %v3126_v49, %v3192_v14 }
 0x3e6   : > { %3201 = vst [vmem:[%s4479_s21 + $0x18] sm:$0xff] %v3193_v34 }
 0x3e7 PF: > { %s27_s26 = sadd.s32 1, %s3642_s26   ;;  %s4640_s24 = smov %s3638_s25 }
 0x3e8   : > { %p24_p5 = scmp.ge.s32.totalorder %s27_s26, 4   ;;  %s4641_s25 = smov %s4643_s27 }
 0x3ea   :  { %26 = sbr.rel (!%p24_p5) target bundleno = 3 (0x3), region = 121 }

</bundles_post_ra>
